<compile_context>
chip_gen: v7x
topology: tpu7x:2x2x1
jax: 0.10.0
libtpu: 0.0.40
codegen_flags: <defaults>
</compile_context>

<pallas_src>
import math
import functools

import jax
import jax.numpy as jnp
from jax.experimental import pallas as pl
from jax.experimental.pallas import tpu as pltpu


def _layernorm(x, g, b, eps):
    m = jnp.mean(x, axis=-1, keepdims=True)
    v = jnp.mean((x - m) ** 2, axis=-1, keepdims=True)
    return (x - m) * jax.lax.rsqrt(v + eps) * g + b


def _mm(a, b):
    # bf16 operands at the MXU, f32 accumulation (works on v5e/v6e/v7x).
    return jnp.dot(a.astype(jnp.bfloat16), b.astype(jnp.bfloat16),
                   preferred_element_type=jnp.float32)


# ---------------------------------------------------------------------------
# Fused kernel: grid = (batch, layer).  One batch element's full sequence per
# step; layer axis is the inner "arbitrary" (reduction-like) axis.
# Dropout is identity (eval-mode semantics).
# ---------------------------------------------------------------------------
def _fused_kernel(x_ref, wqkv_ref, bqkv_ref, wo_ref, bo_ref,
                  ln1g_ref, ln1b_ref, w1_ref, b1_ref, w2_ref, b2_ref,
                  ln2g_ref, ln2b_ref, wout_ref, bout_ref,
                  logits_ref, x_sc, *, nhead, eps):
    l = pl.program_id(1)

    # Load this batch element's activations into resident VMEM scratch once.
    @pl.when(l == 0)
    def _():
        x_sc[...] = x_ref[0]

    x = x_sc[...]                               # (S, D) f32, resident in VMEM
    S, D = x.shape
    hd = D // nhead
    scale = 1.0 / math.sqrt(hd)

    # ---- multi-head self attention (no mask; bidirectional, as in the spec) --
    qkv = _mm(x, wqkv_ref[0]) + bqkv_ref[0]     # (S, 3D)
    q, k, v = qkv[:, :D], qkv[:, D:2 * D], qkv[:, 2 * D:]

    wo = wo_ref[0]                              # (D, D)
    attn = jnp.zeros((S, D), jnp.float32)
    # TODO(synk): a fully head-batched einsum needs an in-kernel
    # (S, D) -> (S, H, hd) lane-split reshape that Mosaic does not reliably
    # lower at these layouts; heads are statically unrolled instead, and the
    # concat is replaced by per-head out-projection + sum (full-D-wide dots).
    for h in range(nhead):
        sl = slice(h * hd, (h + 1) * hd)
        s = _mm(q[:, sl] * scale, k[:, sl].T)   # (S, S)
        s = s - jnp.max(s, axis=-1, keepdims=True)
        p = jnp.exp(s)
        p = p * pl.reciprocal(jnp.sum(p, axis=-1, keepdims=True), approx=True)
        ctx = _mm(p, v[:, sl])                  # (S, hd)
        attn = attn + _mm(ctx, wo[sl, :])       # fold out-proj per head
    attn = attn + bo_ref[0]

    # ---- residual + LayerNorm1 (PyTorch default norm_first=False) ----
    y = _layernorm(x + attn, ln1g_ref[0], ln1b_ref[0], eps)

    # ---- feed-forward (ReLU) + residual + LayerNorm2 ----
    h1 = jnp.maximum(_mm(y, w1_ref[0]) + b1_ref[0], 0.0)
    z = _mm(h1, w2_ref[0]) + b2_ref[0]
    out = _layernorm(y + z, ln2g_ref[0], ln2b_ref[0], eps)
    x_sc[...] = out                             # carry to next layer step

    # ---- fc_out fused into the last layer step (lane-dense padded vocab) ----
    @pl.when(l == pl.num_programs(1) - 1)
    def _():
        logits_ref[0] = (_mm(out, wout_ref[...]) + bout_ref[...]
                         ).astype(logits_ref.dtype)
    # TODO(synk): at production sizes (D=256, Dff=1024, S=512) on v7x's 64 MiB
    # VMEM, tile Dff / S with an extra grid axis + f32 accumulator and set
    # vmem_limit_bytes explicitly; unnecessary at these toy shapes.


# ---------------------------------------------------------------------------
# Parameters (deterministic, synthetic) with per-layer weights stacked along a
# leading layer axis so the fused kernel can index them by grid position.
# ---------------------------------------------------------------------------
def init_params(key, vocab, d_model, nhead, num_layers, max_seq):
    assert d_model % nhead == 0
    keys = jax.random.split(key, 2 + num_layers)
    params = {}
    params["emb"] = jax.random.normal(keys[0], (vocab, d_model), jnp.float32) * 0.02

    # sinusoidal positional encoding (same formula as the PyTorch module)
    position = jnp.arange(max_seq, dtype=jnp.float32)[:, None]
    div_term = jnp.exp(jnp.arange(0, d_model, 2, dtype=jnp.float32)
                       * (-math.log(10000.0) / d_model))
    pe = jnp.zeros((max_seq, d_model), jnp.float32)
    pe = pe.at[:, 0::2].set(jnp.sin(position * div_term))
    pe = pe.at[:, 1::2].set(jnp.cos(position * div_term))
    params["pe"] = pe

    dff = 4 * d_model
    names = ("wqkv", "bqkv", "wo", "bo", "ln1_g", "ln1_b",
             "w1", "b1", "w2", "b2", "ln2_g", "ln2_b")
    stacks = {n: [] for n in names}
    for li in range(num_layers):
        lk = jax.random.split(keys[2 + li], 4)
        stacks["wqkv"].append(
            jax.random.normal(lk[0], (d_model, 3 * d_model), jnp.float32) * 0.05)
        stacks["bqkv"].append(jnp.zeros((1, 3 * d_model), jnp.float32))
        stacks["wo"].append(
            jax.random.normal(lk[1], (d_model, d_model), jnp.float32) * 0.05)
        stacks["bo"].append(jnp.zeros((1, d_model), jnp.float32))
        stacks["ln1_g"].append(jnp.ones((1, d_model), jnp.float32))
        stacks["ln1_b"].append(jnp.zeros((1, d_model), jnp.float32))
        stacks["w1"].append(
            jax.random.normal(lk[2], (d_model, dff), jnp.float32) * 0.05)
        stacks["b1"].append(jnp.zeros((1, dff), jnp.float32))
        stacks["w2"].append(
            jax.random.normal(lk[3], (dff, d_model), jnp.float32) * 0.05)
        stacks["b2"].append(jnp.zeros((1, d_model), jnp.float32))
        stacks["ln2_g"].append(jnp.ones((1, d_model), jnp.float32))
        stacks["ln2_b"].append(jnp.zeros((1, d_model), jnp.float32))

    matmul_weights = {"wqkv", "wo", "w1", "w2"}       # stored bf16 (MXU operands)
    for name, lst in stacks.items():
        arr = jnp.stack(lst, axis=0)
        params[name] = arr.astype(jnp.bfloat16) if name in matmul_weights else arr

    params["w_out"] = (jax.random.normal(keys[1], (d_model, vocab), jnp.float32)
                       * 0.05).astype(jnp.bfloat16)
    params["b_out"] = jnp.zeros((1, vocab), jnp.float32)
    return params


# ---------------------------------------------------------------------------
# Full forward pass
# ---------------------------------------------------------------------------
def melody_transformer_forward(tokens, params, nhead):
    D = params["emb"].shape[1]
    B, S = tokens.shape
    L = params["wqkv"].shape[0]
    Dff = params["w1"].shape[-1]
    V = params["w_out"].shape[1]
    Vp = ((V + 127) // 128) * 128                     # lane-dense vocab padding

    # embedding lookup + scale + positional encoding (plain-JAX glue; gather
    # has no clean Pallas equivalent at this size)
    x = (params["emb"][tokens] * math.sqrt(D) + params["pe"][:S]).astype(jnp.float32)
    # TODO(synk): nn.Dropout(p=0.1) is stochastic in training mode; implemented
    # as identity (eval-mode semantics).

    w_out = jnp.zeros((D, Vp), params["w_out"].dtype).at[:, :V].set(params["w_out"])
    b_out = jnp.zeros((1, Vp), jnp.float32).at[:, :V].set(params["b_out"])

    layer_spec = lambda shape: pl.BlockSpec((1,) + shape, lambda b, l: (l, 0, 0))
    const_spec = lambda shape: pl.BlockSpec(shape, lambda b, l: (0,) * len(shape))

    kernel = functools.partial(_fused_kernel, nhead=nhead, eps=1e-5)
    logits_padded = pl.pallas_call(
        kernel,
        out_shape=jax.ShapeDtypeStruct((B, S, Vp), jnp.float32),
        grid=(B, L),
        in_specs=[
            pl.BlockSpec((1, S, D), lambda b, l: (b, 0, 0)),   # x
            layer_spec((D, 3 * D)), layer_spec((1, 3 * D)),    # wqkv, bqkv
            layer_spec((D, D)), layer_spec((1, D)),            # wo, bo
            layer_spec((1, D)), layer_spec((1, D)),            # ln1 g, b
            layer_spec((D, Dff)), layer_spec((1, Dff)),        # w1, b1
            layer_spec((Dff, D)), layer_spec((1, D)),          # w2, b2
            layer_spec((1, D)), layer_spec((1, D)),            # ln2 g, b
            const_spec((D, Vp)), const_spec((1, Vp)),          # w_out, b_out
        ],
        out_specs=pl.BlockSpec((1, S, Vp), lambda b, l: (b, 0, 0)),
        scratch_shapes=[pltpu.VMEM((S, D), jnp.float32)],      # resident activations
        compiler_params=pltpu.CompilerParams(
            dimension_semantics=("parallel", "arbitrary")),
    )(x, params["wqkv"], params["bqkv"], params["wo"], params["bo"],
      params["ln1_g"], params["ln1_b"], params["w1"], params["b1"],
      params["w2"], params["b2"], params["ln2_g"], params["ln2_b"],
      w_out, b_out)

    return logits_padded[:, :, :V]


if __name__ == "__main__":
    vocab_size, d_model, nhead, num_layers, max_seq = 64, 32, 4, 2, 16
    B, S = 2, 8

    key = jax.random.PRNGKey(0)
    pkey, tkey = jax.random.split(key)
    params = init_params(pkey, vocab_size, d_model, nhead, num_layers, max_seq)
    tokens = jax.random.randint(tkey, (B, S), 0, vocab_size, dtype=jnp.int32)

    logits = melody_transformer_forward(tokens, params, nhead)
    jax.block_until_ready(logits)
    assert logits.shape == (B, S, vocab_size)
    assert bool(jnp.all(jnp.isfinite(logits)))
    print("KERNEL_OK")
</pallas_src>

<mosaic_0001>
module attributes {stable_mosaic.version = 11 : i64} {
  func.func @_fused_kernel(%arg0: i32, %arg1: i32, %arg2: memref<1x8x32xf32, #tpu.memory_space<vmem>>, %arg3: memref<1x32x96xbf16, #tpu.memory_space<vmem>>, %arg4: memref<1x1x96xf32, #tpu.memory_space<vmem>>, %arg5: memref<1x32x32xbf16, #tpu.memory_space<vmem>>, %arg6: memref<1x1x32xf32, #tpu.memory_space<vmem>>, %arg7: memref<1x1x32xf32, #tpu.memory_space<vmem>>, %arg8: memref<1x1x32xf32, #tpu.memory_space<vmem>>, %arg9: memref<1x32x128xbf16, #tpu.memory_space<vmem>>, %arg10: memref<1x1x128xf32, #tpu.memory_space<vmem>>, %arg11: memref<1x128x32xbf16, #tpu.memory_space<vmem>>, %arg12: memref<1x1x32xf32, #tpu.memory_space<vmem>>, %arg13: memref<1x1x32xf32, #tpu.memory_space<vmem>>, %arg14: memref<1x1x32xf32, #tpu.memory_space<vmem>>, %arg15: memref<32x128xbf16, #tpu.memory_space<vmem>>, %arg16: memref<1x128xf32, #tpu.memory_space<vmem>>, %arg17: memref<1x8x128xf32, #tpu.memory_space<vmem>>, %arg18: memref<8x32xf32, #tpu.memory_space<vmem>>) attributes {dimension_semantics = [#tpu.dimension_semantics<parallel>, #tpu.dimension_semantics<arbitrary>], iteration_bounds = array<i64: 2, 2>, scalar_prefetch = 0 : i64, scratch_operands = 1 : i64, tpu.core_type = #tpu.core_type<tc>, window_params = [{transform_indices = @transform_0, window_bounds = array<i64: 1, 8, 32>}, {transform_indices = @transform_1, window_bounds = array<i64: 1, 32, 96>}, {transform_indices = @transform_2, window_bounds = array<i64: 1, 1, 96>}, {transform_indices = @transform_3, window_bounds = array<i64: 1, 32, 32>}, {transform_indices = @transform_4, window_bounds = array<i64: 1, 1, 32>}, {transform_indices = @transform_5, window_bounds = array<i64: 1, 1, 32>}, {transform_indices = @transform_6, window_bounds = array<i64: 1, 1, 32>}, {transform_indices = @transform_7, window_bounds = array<i64: 1, 32, 128>}, {transform_indices = @transform_8, window_bounds = array<i64: 1, 1, 128>}, {transform_indices = @transform_9, window_bounds = array<i64: 1, 128, 32>}, {transform_indices = @transform_10, window_bounds = array<i64: 1, 1, 32>}, {transform_indices = @transform_11, window_bounds = array<i64: 1, 1, 32>}, {transform_indices = @transform_12, window_bounds = array<i64: 1, 1, 32>}, {pipeline_mode = #tpu.pipeline_mode<synchronous>, transform_indices = @transform_13, window_bounds = array<i64: 32, 128>}, {pipeline_mode = #tpu.pipeline_mode<synchronous>, transform_indices = @transform_14, window_bounds = array<i64: 1, 128>}, {transform_indices = @transform_15, window_bounds = array<i64: 1, 8, 128>}]} {
    %c0_i32 = arith.constant 0 : i32
    %0 = arith.cmpi eq, %arg1, %c0_i32 : i32
    %1 = arith.extui %0 : i1 to i32
    %c0_i32_0 = arith.constant 0 : i32
    %2 = arith.cmpi ne, %1, %c0_i32_0 : i32
    scf.if %2 {
      %c0_79 = arith.constant 0 : index
      %c0_80 = arith.constant 0 : index
      %c0_81 = arith.constant 0 : index
      %202 = vector.load %arg2[%c0_79, %c0_80, %c0_81] : memref<1x8x32xf32, #tpu.memory_space<vmem>>, vector<1x8x32xf32>
      %203 = vector.shape_cast %202 : vector<1x8x32xf32> to vector<8x32xf32>
      %c0_82 = arith.constant 0 : index
      %c0_83 = arith.constant 0 : index
      %204 = vector.load %arg18[%c0_82, %c0_83] : memref<8x32xf32, #tpu.memory_space<vmem>>, vector<8x32xf32>
      tpu.vector_store %arg18[%c0_82, %c0_83], %203 {strides = array<i32>} : memref<8x32xf32, #tpu.memory_space<vmem>>, vector<8x32xf32>,
    } else {
    }
    %c0 = arith.constant 0 : index
    %c0_1 = arith.constant 0 : index
    %3 = vector.load %arg18[%c0, %c0_1] : memref<8x32xf32, #tpu.memory_space<vmem>>, vector<8x32xf32>
    %c0_2 = arith.constant 0 : index
    %c0_3 = arith.constant 0 : index
    %c0_4 = arith.constant 0 : index
    %4 = vector.load %arg3[%c0_2, %c0_3, %c0_4] : memref<1x32x96xbf16, #tpu.memory_space<vmem>>, vector<1x32x96xbf16>
    %5 = vector.shape_cast %4 : vector<1x32x96xbf16> to vector<32x96xbf16>
    %6 = arith.truncf %3 : vector<8x32xf32> to vector<8x32xbf16>
    %cst = arith.constant dense<0.000000e+00> : vector<8x96xf32>
    %7 = tpu.matmul %6, %5, %cst {dimension_numbers = #tpu.dot_dimension_numbers<[1], [0], [0], [1], [0, 0, 1, 1], [], []>} : vector<8x32xbf16>, vector<32x96xbf16>, vector<8x96xf32> -> vector<8x96xf32>
    %c0_5 = arith.constant 0 : index
    %c0_6 = arith.constant 0 : index
    %c0_7 = arith.constant 0 : index
    %8 = vector.load %arg4[%c0_5, %c0_6, %c0_7] : memref<1x1x96xf32, #tpu.memory_space<vmem>>, vector<1x1x96xf32>
    %9 = vector.shape_cast %8 : vector<1x1x96xf32> to vector<1x96xf32>
    %10 = vector.broadcast %9 : vector<1x96xf32> to vector<8x96xf32>
    %11 = arith.addf %7, %10 : vector<8x96xf32>
    %12 = vector.extract_strided_slice %11 {offsets = [0, 0], sizes = [8, 32], strides = [1, 1]} : vector<8x96xf32> to vector<8x32xf32>
    %13 = vector.extract_strided_slice %11 {offsets = [0, 32], sizes = [8, 32], strides = [1, 1]} : vector<8x96xf32> to vector<8x32xf32>
    %14 = vector.extract_strided_slice %11 {offsets = [0, 64], sizes = [8, 32], strides = [1, 1]} : vector<8x96xf32> to vector<8x32xf32>
    %c0_8 = arith.constant 0 : index
    %c0_9 = arith.constant 0 : index
    %c0_10 = arith.constant 0 : index
    %15 = vector.load %arg5[%c0_8, %c0_9, %c0_10] : memref<1x32x32xbf16, #tpu.memory_space<vmem>>, vector<1x32x32xbf16>
    %16 = vector.shape_cast %15 : vector<1x32x32xbf16> to vector<32x32xbf16>
    %cst_11 = arith.constant 0.000000e+00 : f32
    %17 = vector.broadcast %cst_11 : f32 to vector<8x32xf32>
    %18 = vector.extract_strided_slice %12 {offsets = [0, 0], sizes = [8, 8], strides = [1, 1]} : vector<8x32xf32> to vector<8x8xf32>
    %cst_12 = arith.constant 0.353553385 : f32
    %19 = vector.broadcast %cst_12 : f32 to vector<8x8xf32>
    %20 = arith.mulf %18, %19 : vector<8x8xf32>
    %21 = vector.extract_strided_slice %13 {offsets = [0, 0], sizes = [8, 8], strides = [1, 1]} : vector<8x32xf32> to vector<8x8xf32>
    %22 = tpu.transpose %21, [1, 0] : vector<8x8xf32> -> vector<8x8xf32>
    %23 = arith.truncf %20 : vector<8x8xf32> to vector<8x8xbf16>
    %24 = arith.truncf %22 : vector<8x8xf32> to vector<8x8xbf16>
    %cst_13 = arith.constant dense<0.000000e+00> : vector<8x8xf32>
    %25 = tpu.matmul %23, %24, %cst_13 {dimension_numbers = #tpu.dot_dimension_numbers<[1], [0], [0], [1], [0, 0, 1, 1], [], []>} : vector<8x8xbf16>, vector<8x8xbf16>, vector<8x8xf32> -> vector<8x8xf32>
    %cst_14 = arith.constant dense<0xFF800000> : vector<8xf32>
    %26 = vector.multi_reduction <maximumf>, %25, %cst_14 [1] : vector<8x8xf32> to vector<8xf32>
    %27 = vector.shape_cast %26 : vector<8xf32> to vector<8x1xf32>
    %28 = vector.broadcast %27 : vector<8x1xf32> to vector<8x8xf32>
    %29 = arith.subf %25, %28 : vector<8x8xf32>
    %30 = math.exp %29 : vector<8x8xf32>
    %cst_15 = arith.constant dense<0.000000e+00> : vector<8xf32>
    %31 = vector.multi_reduction <add>, %30, %cst_15 [1] : vector<8x8xf32> to vector<8xf32>
    %32 = vector.shape_cast %31 : vector<8xf32> to vector<8x1xf32>
    %33 = tpu.reciprocal %32 {approx = true} : vector<8x1xf32> -> vector<8x1xf32>
    %34 = vector.broadcast %33 : vector<8x1xf32> to vector<8x8xf32>
    %35 = arith.mulf %30, %34 : vector<8x8xf32>
    %36 = vector.extract_strided_slice %14 {offsets = [0, 0], sizes = [8, 8], strides = [1, 1]} : vector<8x32xf32> to vector<8x8xf32>
    %37 = arith.truncf %35 : vector<8x8xf32> to vector<8x8xbf16>
    %38 = arith.truncf %36 : vector<8x8xf32> to vector<8x8xbf16>
    %cst_16 = arith.constant dense<0.000000e+00> : vector<8x8xf32>
    %39 = tpu.matmul %37, %38, %cst_16 {dimension_numbers = #tpu.dot_dimension_numbers<[1], [0], [0], [1], [0, 0, 1, 1], [], []>} : vector<8x8xbf16>, vector<8x8xbf16>, vector<8x8xf32> -> vector<8x8xf32>
    %40 = vector.extract_strided_slice %16 {offsets = [0, 0], sizes = [8, 32], strides = [1, 1]} : vector<32x32xbf16> to vector<8x32xbf16>
    %41 = arith.truncf %39 : vector<8x8xf32> to vector<8x8xbf16>
    %cst_17 = arith.constant dense<0.000000e+00> : vector<8x32xf32>
    %42 = tpu.matmul %41, %40, %cst_17 {dimension_numbers = #tpu.dot_dimension_numbers<[1], [0], [0], [1], [0, 0, 1, 1], [], []>} : vector<8x8xbf16>, vector<8x32xbf16>, vector<8x32xf32> -> vector<8x32xf32>
    %43 = arith.addf %17, %42 : vector<8x32xf32>
    %44 = vector.extract_strided_slice %12 {offsets = [0, 8], sizes = [8, 8], strides = [1, 1]} : vector<8x32xf32> to vector<8x8xf32>
    %cst_18 = arith.constant 0.353553385 : f32
    %45 = vector.broadcast %cst_18 : f32 to vector<8x8xf32>
    %46 = arith.mulf %44, %45 : vector<8x8xf32>
    %47 = vector.extract_strided_slice %13 {offsets = [0, 8], sizes = [8, 8], strides = [1, 1]} : vector<8x32xf32> to vector<8x8xf32>
    %48 = tpu.transpose %47, [1, 0] : vector<8x8xf32> -> vector<8x8xf32>
    %49 = arith.truncf %46 : vector<8x8xf32> to vector<8x8xbf16>
    %50 = arith.truncf %48 : vector<8x8xf32> to vector<8x8xbf16>
    %cst_19 = arith.constant dense<0.000000e+00> : vector<8x8xf32>
    %51 = tpu.matmul %49, %50, %cst_19 {dimension_numbers = #tpu.dot_dimension_numbers<[1], [0], [0], [1], [0, 0, 1, 1], [], []>} : vector<8x8xbf16>, vector<8x8xbf16>, vector<8x8xf32> -> vector<8x8xf32>
    %cst_20 = arith.constant dense<0xFF800000> : vector<8xf32>
    %52 = vector.multi_reduction <maximumf>, %51, %cst_20 [1] : vector<8x8xf32> to vector<8xf32>
    %53 = vector.shape_cast %52 : vector<8xf32> to vector<8x1xf32>
    %54 = vector.broadcast %53 : vector<8x1xf32> to vector<8x8xf32>
    %55 = arith.subf %51, %54 : vector<8x8xf32>
    %56 = math.exp %55 : vector<8x8xf32>
    %cst_21 = arith.constant dense<0.000000e+00> : vector<8xf32>
    %57 = vector.multi_reduction <add>, %56, %cst_21 [1] : vector<8x8xf32> to vector<8xf32>
    %58 = vector.shape_cast %57 : vector<8xf32> to vector<8x1xf32>
    %59 = tpu.reciprocal %58 {approx = true} : vector<8x1xf32> -> vector<8x1xf32>
    %60 = vector.broadcast %59 : vector<8x1xf32> to vector<8x8xf32>
    %61 = arith.mulf %56, %60 : vector<8x8xf32>
    %62 = vector.extract_strided_slice %14 {offsets = [0, 8], sizes = [8, 8], strides = [1, 1]} : vector<8x32xf32> to vector<8x8xf32>
    %63 = arith.truncf %61 : vector<8x8xf32> to vector<8x8xbf16>
    %64 = arith.truncf %62 : vector<8x8xf32> to vector<8x8xbf16>
    %cst_22 = arith.constant dense<0.000000e+00> : vector<8x8xf32>
    %65 = tpu.matmul %63, %64, %cst_22 {dimension_numbers = #tpu.dot_dimension_numbers<[1], [0], [0], [1], [0, 0, 1, 1], [], []>} : vector<8x8xbf16>, vector<8x8xbf16>, vector<8x8xf32> -> vector<8x8xf32>
    %66 = vector.extract_strided_slice %16 {offsets = [8, 0], sizes = [8, 32], strides = [1, 1]} : vector<32x32xbf16> to vector<8x32xbf16>
    %67 = arith.truncf %65 : vector<8x8xf32> to vector<8x8xbf16>
    %cst_23 = arith.constant dense<0.000000e+00> : vector<8x32xf32>
    %68 = tpu.matmul %67, %66, %cst_23 {dimension_numbers = #tpu.dot_dimension_numbers<[1], [0], [0], [1], [0, 0, 1, 1], [], []>} : vector<8x8xbf16>, vector<8x32xbf16>, vector<8x32xf32> -> vector<8x32xf32>
    %69 = arith.addf %43, %68 : vector<8x32xf32>
    %70 = vector.extract_strided_slice %12 {offsets = [0, 16], sizes = [8, 8], strides = [1, 1]} : vector<8x32xf32> to vector<8x8xf32>
    %cst_24 = arith.constant 0.353553385 : f32
    %71 = vector.broadcast %cst_24 : f32 to vector<8x8xf32>
    %72 = arith.mulf %70, %71 : vector<8x8xf32>
    %73 = vector.extract_strided_slice %13 {offsets = [0, 16], sizes = [8, 8], strides = [1, 1]} : vector<8x32xf32> to vector<8x8xf32>
    %74 = tpu.transpose %73, [1, 0] : vector<8x8xf32> -> vector<8x8xf32>
    %75 = arith.truncf %72 : vector<8x8xf32> to vector<8x8xbf16>
    %76 = arith.truncf %74 : vector<8x8xf32> to vector<8x8xbf16>
    %cst_25 = arith.constant dense<0.000000e+00> : vector<8x8xf32>
    %77 = tpu.matmul %75, %76, %cst_25 {dimension_numbers = #tpu.dot_dimension_numbers<[1], [0], [0], [1], [0, 0, 1, 1], [], []>} : vector<8x8xbf16>, vector<8x8xbf16>, vector<8x8xf32> -> vector<8x8xf32>
    %cst_26 = arith.constant dense<0xFF800000> : vector<8xf32>
    %78 = vector.multi_reduction <maximumf>, %77, %cst_26 [1] : vector<8x8xf32> to vector<8xf32>
    %79 = vector.shape_cast %78 : vector<8xf32> to vector<8x1xf32>
    %80 = vector.broadcast %79 : vector<8x1xf32> to vector<8x8xf32>
    %81 = arith.subf %77, %80 : vector<8x8xf32>
    %82 = math.exp %81 : vector<8x8xf32>
    %cst_27 = arith.constant dense<0.000000e+00> : vector<8xf32>
    %83 = vector.multi_reduction <add>, %82, %cst_27 [1] : vector<8x8xf32> to vector<8xf32>
    %84 = vector.shape_cast %83 : vector<8xf32> to vector<8x1xf32>
    %85 = tpu.reciprocal %84 {approx = true} : vector<8x1xf32> -> vector<8x1xf32>
    %86 = vector.broadcast %85 : vector<8x1xf32> to vector<8x8xf32>
    %87 = arith.mulf %82, %86 : vector<8x8xf32>
    %88 = vector.extract_strided_slice %14 {offsets = [0, 16], sizes = [8, 8], strides = [1, 1]} : vector<8x32xf32> to vector<8x8xf32>
    %89 = arith.truncf %87 : vector<8x8xf32> to vector<8x8xbf16>
    %90 = arith.truncf %88 : vector<8x8xf32> to vector<8x8xbf16>
    %cst_28 = arith.constant dense<0.000000e+00> : vector<8x8xf32>
    %91 = tpu.matmul %89, %90, %cst_28 {dimension_numbers = #tpu.dot_dimension_numbers<[1], [0], [0], [1], [0, 0, 1, 1], [], []>} : vector<8x8xbf16>, vector<8x8xbf16>, vector<8x8xf32> -> vector<8x8xf32>
    %92 = vector.extract_strided_slice %16 {offsets = [16, 0], sizes = [8, 32], strides = [1, 1]} : vector<32x32xbf16> to vector<8x32xbf16>
    %93 = arith.truncf %91 : vector<8x8xf32> to vector<8x8xbf16>
    %cst_29 = arith.constant dense<0.000000e+00> : vector<8x32xf32>
    %94 = tpu.matmul %93, %92, %cst_29 {dimension_numbers = #tpu.dot_dimension_numbers<[1], [0], [0], [1], [0, 0, 1, 1], [], []>} : vector<8x8xbf16>, vector<8x32xbf16>, vector<8x32xf32> -> vector<8x32xf32>
    %95 = arith.addf %69, %94 : vector<8x32xf32>
    %96 = vector.extract_strided_slice %12 {offsets = [0, 24], sizes = [8, 8], strides = [1, 1]} : vector<8x32xf32> to vector<8x8xf32>
    %cst_30 = arith.constant 0.353553385 : f32
    %97 = vector.broadcast %cst_30 : f32 to vector<8x8xf32>
    %98 = arith.mulf %96, %97 : vector<8x8xf32>
    %99 = vector.extract_strided_slice %13 {offsets = [0, 24], sizes = [8, 8], strides = [1, 1]} : vector<8x32xf32> to vector<8x8xf32>
    %100 = tpu.transpose %99, [1, 0] : vector<8x8xf32> -> vector<8x8xf32>
    %101 = arith.truncf %98 : vector<8x8xf32> to vector<8x8xbf16>
    %102 = arith.truncf %100 : vector<8x8xf32> to vector<8x8xbf16>
    %cst_31 = arith.constant dense<0.000000e+00> : vector<8x8xf32>
    %103 = tpu.matmul %101, %102, %cst_31 {dimension_numbers = #tpu.dot_dimension_numbers<[1], [0], [0], [1], [0, 0, 1, 1], [], []>} : vector<8x8xbf16>, vector<8x8xbf16>, vector<8x8xf32> -> vector<8x8xf32>
    %cst_32 = arith.constant dense<0xFF800000> : vector<8xf32>
    %104 = vector.multi_reduction <maximumf>, %103, %cst_32 [1] : vector<8x8xf32> to vector<8xf32>
    %105 = vector.shape_cast %104 : vector<8xf32> to vector<8x1xf32>
    %106 = vector.broadcast %105 : vector<8x1xf32> to vector<8x8xf32>
    %107 = arith.subf %103, %106 : vector<8x8xf32>
    %108 = math.exp %107 : vector<8x8xf32>
    %cst_33 = arith.constant dense<0.000000e+00> : vector<8xf32>
    %109 = vector.multi_reduction <add>, %108, %cst_33 [1] : vector<8x8xf32> to vector<8xf32>
    %110 = vector.shape_cast %109 : vector<8xf32> to vector<8x1xf32>
    %111 = tpu.reciprocal %110 {approx = true} : vector<8x1xf32> -> vector<8x1xf32>
    %112 = vector.broadcast %111 : vector<8x1xf32> to vector<8x8xf32>
    %113 = arith.mulf %108, %112 : vector<8x8xf32>
    %114 = vector.extract_strided_slice %14 {offsets = [0, 24], sizes = [8, 8], strides = [1, 1]} : vector<8x32xf32> to vector<8x8xf32>
    %115 = arith.truncf %113 : vector<8x8xf32> to vector<8x8xbf16>
    %116 = arith.truncf %114 : vector<8x8xf32> to vector<8x8xbf16>
    %cst_34 = arith.constant dense<0.000000e+00> : vector<8x8xf32>
    %117 = tpu.matmul %115, %116, %cst_34 {dimension_numbers = #tpu.dot_dimension_numbers<[1], [0], [0], [1], [0, 0, 1, 1], [], []>} : vector<8x8xbf16>, vector<8x8xbf16>, vector<8x8xf32> -> vector<8x8xf32>
    %118 = vector.extract_strided_slice %16 {offsets = [24, 0], sizes = [8, 32], strides = [1, 1]} : vector<32x32xbf16> to vector<8x32xbf16>
    %119 = arith.truncf %117 : vector<8x8xf32> to vector<8x8xbf16>
    %cst_35 = arith.constant dense<0.000000e+00> : vector<8x32xf32>
    %120 = tpu.matmul %119, %118, %cst_35 {dimension_numbers = #tpu.dot_dimension_numbers<[1], [0], [0], [1], [0, 0, 1, 1], [], []>} : vector<8x8xbf16>, vector<8x32xbf16>, vector<8x32xf32> -> vector<8x32xf32>
    %121 = arith.addf %95, %120 : vector<8x32xf32>
    %c0_36 = arith.constant 0 : index
    %c0_37 = arith.constant 0 : index
    %c0_38 = arith.constant 0 : index
    %122 = vector.load %arg6[%c0_36, %c0_37, %c0_38] : memref<1x1x32xf32, #tpu.memory_space<vmem>>, vector<1x1x32xf32>
    %123 = vector.shape_cast %122 : vector<1x1x32xf32> to vector<1x32xf32>
    %124 = vector.broadcast %123 : vector<1x32xf32> to vector<8x32xf32>
    %125 = arith.addf %121, %124 : vector<8x32xf32>
    %126 = arith.addf %3, %125 : vector<8x32xf32>
    %c0_39 = arith.constant 0 : index
    %c0_40 = arith.constant 0 : index
    %c0_41 = arith.constant 0 : index
    %127 = vector.load %arg7[%c0_39, %c0_40, %c0_41] : memref<1x1x32xf32, #tpu.memory_space<vmem>>, vector<1x1x32xf32>
    %128 = vector.shape_cast %127 : vector<1x1x32xf32> to vector<1x32xf32>
    %c0_42 = arith.constant 0 : index
    %c0_43 = arith.constant 0 : index
    %c0_44 = arith.constant 0 : index
    %129 = vector.load %arg8[%c0_42, %c0_43, %c0_44] : memref<1x1x32xf32, #tpu.memory_space<vmem>>, vector<1x1x32xf32>
    %130 = vector.shape_cast %129 : vector<1x1x32xf32> to vector<1x32xf32>
    %cst_45 = arith.constant dense<0.000000e+00> : vector<8xf32>
    %131 = vector.multi_reduction <add>, %126, %cst_45 [1] : vector<8x32xf32> to vector<8xf32>
    %132 = vector.shape_cast %131 : vector<8xf32> to vector<8x1xf32>
    %cst_46 = arith.constant 3.200000e+01 : f32
    %133 = vector.broadcast %cst_46 : f32 to vector<8x1xf32>
    %134 = arith.divf %132, %133 : vector<8x1xf32>
    %135 = vector.broadcast %134 : vector<8x1xf32> to vector<8x32xf32>
    %136 = arith.subf %126, %135 : vector<8x32xf32>
    %137 = arith.mulf %136, %136 : vector<8x32xf32>
    %cst_47 = arith.constant dense<0.000000e+00> : vector<8xf32>
    %138 = vector.multi_reduction <add>, %137, %cst_47 [1] : vector<8x32xf32> to vector<8xf32>
    %139 = vector.shape_cast %138 : vector<8xf32> to vector<8x1xf32>
    %cst_48 = arith.constant 3.200000e+01 : f32
    %140 = vector.broadcast %cst_48 : f32 to vector<8x1xf32>
    %141 = arith.divf %139, %140 : vector<8x1xf32>
    %142 = vector.broadcast %134 : vector<8x1xf32> to vector<8x32xf32>
    %143 = arith.subf %126, %142 : vector<8x32xf32>
    %cst_49 = arith.constant 9.99999974E-6 : f32
    %144 = vector.broadcast %cst_49 : f32 to vector<8x1xf32>
    %145 = arith.addf %141, %144 : vector<8x1xf32>
    %146 = math.rsqrt %145 : vector<8x1xf32>
    %147 = vector.broadcast %146 : vector<8x1xf32> to vector<8x32xf32>
    %148 = arith.mulf %143, %147 : vector<8x32xf32>
    %149 = vector.broadcast %128 : vector<1x32xf32> to vector<8x32xf32>
    %150 = arith.mulf %148, %149 : vector<8x32xf32>
    %151 = vector.broadcast %130 : vector<1x32xf32> to vector<8x32xf32>
    %152 = arith.addf %150, %151 : vector<8x32xf32>
    %c0_50 = arith.constant 0 : index
    %c0_51 = arith.constant 0 : index
    %c0_52 = arith.constant 0 : index
    %153 = vector.load %arg9[%c0_50, %c0_51, %c0_52] : memref<1x32x128xbf16, #tpu.memory_space<vmem>>, vector<1x32x128xbf16>
    %154 = vector.shape_cast %153 : vector<1x32x128xbf16> to vector<32x128xbf16>
    %155 = arith.truncf %152 : vector<8x32xf32> to vector<8x32xbf16>
    %cst_53 = arith.constant dense<0.000000e+00> : vector<8x128xf32>
    %156 = tpu.matmul %155, %154, %cst_53 {dimension_numbers = #tpu.dot_dimension_numbers<[1], [0], [0], [1], [0, 0, 1, 1], [], []>} : vector<8x32xbf16>, vector<32x128xbf16>, vector<8x128xf32> -> vector<8x128xf32>
    %c0_54 = arith.constant 0 : index
    %c0_55 = arith.constant 0 : index
    %c0_56 = arith.constant 0 : index
    %157 = vector.load %arg10[%c0_54, %c0_55, %c0_56] : memref<1x1x128xf32, #tpu.memory_space<vmem>>, vector<1x1x128xf32>
    %158 = vector.shape_cast %157 : vector<1x1x128xf32> to vector<1x128xf32>
    %159 = vector.broadcast %158 : vector<1x128xf32> to vector<8x128xf32>
    %160 = arith.addf %156, %159 : vector<8x128xf32>
    %cst_57 = arith.constant 0.000000e+00 : f32
    %161 = vector.broadcast %cst_57 : f32 to vector<8x128xf32>
    %162 = arith.maximumf %160, %161 : vector<8x128xf32>
    %c0_58 = arith.constant 0 : index
    %c0_59 = arith.constant 0 : index
    %c0_60 = arith.constant 0 : index
    %163 = vector.load %arg11[%c0_58, %c0_59, %c0_60] : memref<1x128x32xbf16, #tpu.memory_space<vmem>>, vector<1x128x32xbf16>
    %164 = vector.shape_cast %163 : vector<1x128x32xbf16> to vector<128x32xbf16>
    %165 = arith.truncf %162 : vector<8x128xf32> to vector<8x128xbf16>
    %cst_61 = arith.constant dense<0.000000e+00> : vector<8x32xf32>
    %166 = tpu.matmul %165, %164, %cst_61 {dimension_numbers = #tpu.dot_dimension_numbers<[1], [0], [0], [1], [0, 0, 1, 1], [], []>} : vector<8x128xbf16>, vector<128x32xbf16>, vector<8x32xf32> -> vector<8x32xf32>
    %c0_62 = arith.constant 0 : index
    %c0_63 = arith.constant 0 : index
    %c0_64 = arith.constant 0 : index
    %167 = vector.load %arg12[%c0_62, %c0_63, %c0_64] : memref<1x1x32xf32, #tpu.memory_space<vmem>>, vector<1x1x32xf32>
    %168 = vector.shape_cast %167 : vector<1x1x32xf32> to vector<1x32xf32>
    %169 = vector.broadcast %168 : vector<1x32xf32> to vector<8x32xf32>
    %170 = arith.addf %166, %169 : vector<8x32xf32>
    %171 = arith.addf %152, %170 : vector<8x32xf32>
    %c0_65 = arith.constant 0 : index
    %c0_66 = arith.constant 0 : index
    %c0_67 = arith.constant 0 : index
    %172 = vector.load %arg13[%c0_65, %c0_66, %c0_67] : memref<1x1x32xf32, #tpu.memory_space<vmem>>, vector<1x1x32xf32>
    %173 = vector.shape_cast %172 : vector<1x1x32xf32> to vector<1x32xf32>
    %c0_68 = arith.constant 0 : index
    %c0_69 = arith.constant 0 : index
    %c0_70 = arith.constant 0 : index
    %174 = vector.load %arg14[%c0_68, %c0_69, %c0_70] : memref<1x1x32xf32, #tpu.memory_space<vmem>>, vector<1x1x32xf32>
    %175 = vector.shape_cast %174 : vector<1x1x32xf32> to vector<1x32xf32>
    %cst_71 = arith.constant dense<0.000000e+00> : vector<8xf32>
    %176 = vector.multi_reduction <add>, %171, %cst_71 [1] : vector<8x32xf32> to vector<8xf32>
    %177 = vector.shape_cast %176 : vector<8xf32> to vector<8x1xf32>
    %cst_72 = arith.constant 3.200000e+01 : f32
    %178 = vector.broadcast %cst_72 : f32 to vector<8x1xf32>
    %179 = arith.divf %177, %178 : vector<8x1xf32>
    %180 = vector.broadcast %179 : vector<8x1xf32> to vector<8x32xf32>
    %181 = arith.subf %171, %180 : vector<8x32xf32>
    %182 = arith.mulf %181, %181 : vector<8x32xf32>
    %cst_73 = arith.constant dense<0.000000e+00> : vector<8xf32>
    %183 = vector.multi_reduction <add>, %182, %cst_73 [1] : vector<8x32xf32> to vector<8xf32>
    %184 = vector.shape_cast %183 : vector<8xf32> to vector<8x1xf32>
    %cst_74 = arith.constant 3.200000e+01 : f32
    %185 = vector.broadcast %cst_74 : f32 to vector<8x1xf32>
    %186 = arith.divf %184, %185 : vector<8x1xf32>
    %187 = vector.broadcast %179 : vector<8x1xf32> to vector<8x32xf32>
    %188 = arith.subf %171, %187 : vector<8x32xf32>
    %cst_75 = arith.constant 9.99999974E-6 : f32
    %189 = vector.broadcast %cst_75 : f32 to vector<8x1xf32>
    %190 = arith.addf %186, %189 : vector<8x1xf32>
    %191 = math.rsqrt %190 : vector<8x1xf32>
    %192 = vector.broadcast %191 : vector<8x1xf32> to vector<8x32xf32>
    %193 = arith.mulf %188, %192 : vector<8x32xf32>
    %194 = vector.broadcast %173 : vector<1x32xf32> to vector<8x32xf32>
    %195 = arith.mulf %193, %194 : vector<8x32xf32>
    %196 = vector.broadcast %175 : vector<1x32xf32> to vector<8x32xf32>
    %197 = arith.addf %195, %196 : vector<8x32xf32>
    %c0_76 = arith.constant 0 : index
    %c0_77 = arith.constant 0 : index
    %198 = vector.load %arg18[%c0_76, %c0_77] : memref<8x32xf32, #tpu.memory_space<vmem>>, vector<8x32xf32>
    tpu.vector_store %arg18[%c0_76, %c0_77], %197 {strides = array<i32>} : memref<8x32xf32, #tpu.memory_space<vmem>>, vector<8x32xf32>,
    %c1_i32 = arith.constant 1 : i32
    %199 = arith.cmpi eq, %arg1, %c1_i32 : i32
    %200 = arith.extui %199 : i1 to i32
    %c0_i32_78 = arith.constant 0 : i32
    %201 = arith.cmpi ne, %200, %c0_i32_78 : i32
    scf.if %201 {
      %c0_79 = arith.constant 0 : index
      %c0_80 = arith.constant 0 : index
      %202 = vector.load %arg15[%c0_79, %c0_80] : memref<32x128xbf16, #tpu.memory_space<vmem>>, vector<32x128xbf16>
      %203 = arith.truncf %197 : vector<8x32xf32> to vector<8x32xbf16>
      %cst_81 = arith.constant dense<0.000000e+00> : vector<8x128xf32>
      %204 = tpu.matmul %203, %202, %cst_81 {dimension_numbers = #tpu.dot_dimension_numbers<[1], [0], [0], [1], [0, 0, 1, 1], [], []>} : vector<8x32xbf16>, vector<32x128xbf16>, vector<8x128xf32> -> vector<8x128xf32>
      %c0_82 = arith.constant 0 : index
      %c0_83 = arith.constant 0 : index
      %205 = vector.load %arg16[%c0_82, %c0_83] : memref<1x128xf32, #tpu.memory_space<vmem>>, vector<1x128xf32>
      %206 = vector.broadcast %205 : vector<1x128xf32> to vector<8x128xf32>
      %207 = arith.addf %204, %206 : vector<8x128xf32>
      %c0_84 = arith.constant 0 : index
      %c0_85 = arith.constant 0 : index
      %c0_86 = arith.constant 0 : index
      %208 = vector.load %arg17[%c0_84, %c0_85, %c0_86] : memref<1x8x128xf32, #tpu.memory_space<vmem>>, vector<1x8x128xf32>
      %209 = vector.shape_cast %208 : vector<1x8x128xf32> to vector<8x128xf32>
      %210 = vector.shape_cast %207 : vector<8x128xf32> to vector<1x8x128xf32>
      tpu.vector_store %arg17[%c0_84, %c0_85, %c0_86], %210 {strides = array<i32>} : memref<1x8x128xf32, #tpu.memory_space<vmem>>, vector<1x8x128xf32>,
    } else {
    }
    return
  }
  func.func @transform_0(%arg0: i32, %arg1: i32) -> (i32, i32, i32) {
    %c0_i32 = arith.constant 0 : i32
    %c0_i32_0 = arith.constant 0 : i32
    %c0_i32_1 = arith.constant 0 : i32
    return %arg0, %c0_i32, %c0_i32_0 : i32, i32, i32
  }
  func.func @transform_1(%arg0: i32, %arg1: i32) -> (i32, i32, i32) {
    %c0_i32 = arith.constant 0 : i32
    %c0_i32_0 = arith.constant 0 : i32
    %c0_i32_1 = arith.constant 0 : i32
    return %arg1, %c0_i32, %c0_i32_0 : i32, i32, i32
  }
  func.func @transform_2(%arg0: i32, %arg1: i32) -> (i32, i32, i32) {
    %c0_i32 = arith.constant 0 : i32
    %c0_i32_0 = arith.constant 0 : i32
    %c0_i32_1 = arith.constant 0 : i32
    return %arg1, %c0_i32, %c0_i32_0 : i32, i32, i32
  }
  func.func @transform_3(%arg0: i32, %arg1: i32) -> (i32, i32, i32) {
    %c0_i32 = arith.constant 0 : i32
    %c0_i32_0 = arith.constant 0 : i32
    %c0_i32_1 = arith.constant 0 : i32
    return %arg1, %c0_i32, %c0_i32_0 : i32, i32, i32
  }
  func.func @transform_4(%arg0: i32, %arg1: i32) -> (i32, i32, i32) {
    %c0_i32 = arith.constant 0 : i32
    %c0_i32_0 = arith.constant 0 : i32
    %c0_i32_1 = arith.constant 0 : i32
    return %arg1, %c0_i32, %c0_i32_0 : i32, i32, i32
  }
  func.func @transform_5(%arg0: i32, %arg1: i32) -> (i32, i32, i32) {
    %c0_i32 = arith.constant 0 : i32
    %c0_i32_0 = arith.constant 0 : i32
    %c0_i32_1 = arith.constant 0 : i32
    return %arg1, %c0_i32, %c0_i32_0 : i32, i32, i32
  }
  func.func @transform_6(%arg0: i32, %arg1: i32) -> (i32, i32, i32) {
    %c0_i32 = arith.constant 0 : i32
    %c0_i32_0 = arith.constant 0 : i32
    %c0_i32_1 = arith.constant 0 : i32
    return %arg1, %c0_i32, %c0_i32_0 : i32, i32, i32
  }
  func.func @transform_7(%arg0: i32, %arg1: i32) -> (i32, i32, i32) {
    %c0_i32 = arith.constant 0 : i32
    %c0_i32_0 = arith.constant 0 : i32
    %c0_i32_1 = arith.constant 0 : i32
    return %arg1, %c0_i32, %c0_i32_0 : i32, i32, i32
  }
  func.func @transform_8(%arg0: i32, %arg1: i32) -> (i32, i32, i32) {
    %c0_i32 = arith.constant 0 : i32
    %c0_i32_0 = arith.constant 0 : i32
    %c0_i32_1 = arith.constant 0 : i32
    return %arg1, %c0_i32, %c0_i32_0 : i32, i32, i32
  }
  func.func @transform_9(%arg0: i32, %arg1: i32) -> (i32, i32, i32) {
    %c0_i32 = arith.constant 0 : i32
    %c0_i32_0 = arith.constant 0 : i32
    %c0_i32_1 = arith.constant 0 : i32
    return %arg1, %c0_i32, %c0_i32_0 : i32, i32, i32
  }
  func.func @transform_10(%arg0: i32, %arg1: i32) -> (i32, i32, i32) {
    %c0_i32 = arith.constant 0 : i32
    %c0_i32_0 = arith.constant 0 : i32
    %c0_i32_1 = arith.constant 0 : i32
    return %arg1, %c0_i32, %c0_i32_0 : i32, i32, i32
  }
  func.func @transform_11(%arg0: i32, %arg1: i32) -> (i32, i32, i32) {
    %c0_i32 = arith.constant 0 : i32
    %c0_i32_0 = arith.constant 0 : i32
    %c0_i32_1 = arith.constant 0 : i32
    return %arg1, %c0_i32, %c0_i32_0 : i32, i32, i32
  }
  func.func @transform_12(%arg0: i32, %arg1: i32) -> (i32, i32, i32) {
    %c0_i32 = arith.constant 0 : i32
    %c0_i32_0 = arith.constant 0 : i32
    %c0_i32_1 = arith.constant 0 : i32
    return %arg1, %c0_i32, %c0_i32_0 : i32, i32, i32
  }
  func.func @transform_13(%arg0: i32, %arg1: i32) -> (i32, i32) {
    %c0_i32 = arith.constant 0 : i32
    %c0_i32_0 = arith.constant 0 : i32
    %c0_i32_1 = arith.constant 0 : i32
    return %c0_i32, %c0_i32_0 : i32, i32
  }
  func.func @transform_14(%arg0: i32, %arg1: i32) -> (i32, i32) {
    %c0_i32 = arith.constant 0 : i32
    %c0_i32_0 = arith.constant 0 : i32
    %c0_i32_1 = arith.constant 0 : i32
    return %c0_i32, %c0_i32_0 : i32, i32
  }
  func.func @transform_15(%arg0: i32, %arg1: i32) -> (i32, i32, i32) {
    %c0_i32 = arith.constant 0 : i32
    %c0_i32_0 = arith.constant 0 : i32
    %c0_i32_1 = arith.constant 0 : i32
    return %arg0, %c0_i32, %c0_i32_0 : i32, i32, i32
  }
}

</mosaic_0001>

<bundles_post_ra>
// kernel: tpu_custom_call.1
= control target key start
LH: loop header
LB: loop body
LE: loop exit
PB: predicated region body
PF: predicated region fallthrough
CT: control target
= control target key end

     0   :  { %s2987_s0 = inlined_call_operand.vmem [shape: f32[2,8,32], index: 0, kind: input, shape index: {}]   ;;  %s2988_s1 = inlined_call_operand.vmem [shape: bf16[2,32,96], index: 1, kind: input, shape index: {}]   ;;  %s2989_s2 = inlined_call_operand.vmem [shape: f32[2,1,96], index: 2, kind: input, shape index: {}]   ;;  %s2990_s3 = inlined_call_operand.vmem [shape: bf16[2,32,32], index: 3, kind: input, shape index: {}]   ;;  %s2991_s4 = inlined_call_operand.vmem [shape: f32[2,1,32], index: 4, kind: input, shape index: {}]   ;;  %s2992_s5 = inlined_call_operand.vmem [shape: f32[2,1,32], index: 5, kind: input, shape index: {}]   ;;  %s2993_s6 = inlined_call_operand.vmem [shape: f32[2,1,32], index: 6, kind: input, shape index: {}]   ;;  %s2994_s7 = inlined_call_operand.vmem [shape: bf16[2,32,128], index: 7, kind: input, shape index: {}]   ;;  %s2995_s8 = inlined_call_operand.vmem [shape: f32[2,1,128], index: 8, kind: input, shape index: {}]   ;;  %s2996_s9 = inlined_call_operand.vmem [shape: bf16[2,128,32], index: 9, kind: input, shape index: {}]   ;;  %s2997_s10 = inlined_call_operand.vmem [shape: f32[2,1,32], index: 10, kind: input, shape index: {}]   ;;  %s2998_s11 = inlined_call_operand.vmem [shape: f32[2,1,32], index: 11, kind: input, shape index: {}]   ;;  %s2999_s12 = inlined_call_operand.vmem [shape: f32[2,1,32], index: 12, kind: input, shape index: {}]   ;;  %s3000_s13 = inlined_call_operand.vmem [shape: bf16[32,128], index: 13, kind: input, shape index: {}]   ;;  %s3001_s14 = inlined_call_operand.vmem [shape: f32[1,128], index: 14, kind: input, shape index: {}]   ;;  %s3002_s15 = inlined_call_operand.hbm [shape: f32[2,8,128], index: 15, kind: output, shape index: {}]  }
   0x1   :  { %3019 = sst [smem:[#allocation19_spill]] %s2987_s0 }
   0x2   :  { %3020 = sst [smem:[#allocation20_spill]] %s2988_s1 }
   0x3   :  { %3021 = sst [smem:[#allocation21_spill]] %s2990_s3 }
   0x4   :  { %3022 = sst [smem:[#allocation22_spill]] %s2994_s7 }
   0x5   :  { %3023 = sst [smem:[#allocation23_spill]] %s2999_s12 }
   0x6   :  { %3024 = sst [smem:[#allocation24_spill]] %s3000_s13 }
   0x7   :  { %3025 = sst [smem:[#allocation25_spill]] %s3001_s14 }
   0x8   :  { %3026 = sst [smem:[#allocation26_spill]] %s3002_s15 }
   0x9   :  { %20 = vsyncpa [#allocation4], 0 }
   0xa   :  { %22 = vsyncpa [#allocation4 + $0x1], 0  ;;  %s2606_s18 = smov 0   ;;  %s2608_s19 = smov 0  }
   0xb   :  { %s2610_s20 = smov 0   ;;  %s2612_s21 = smov 0  }
   0xc   :  { %s2614_s22 = smov 0   ;;  %s2616_s23 = smov 0  }
   0xd   :  { %s2618_s24 = smov 0   ;;  %s2620_s25 = smov 0  }
   0xe LB: > { %3027 = sst [smem:[#allocation6_spill]] %s2480_s18  ;;  %s2073_s26 = sadd.s32 4294967295, %s2508_s25   ;;  %s2508_s25 = sphi %s2620_s25, %s28_s25   ;;  %s2504_s24 = sphi %s2618_s24, %s3070_s24   ;;  %s2500_s23 = sphi %s2616_s23, %s3069_s23   ;;  %s2496_s22 = sphi %s2614_s22, %s3068_s22   ;;  %s2492_s21 = sphi %s2612_s21, %s3067_s21   ;;  %s2488_s20 = sphi %s2610_s20, %s3066_s20   ;;  %s2484_s19 = sphi %s2608_s19, %s3065_s19   ;;  %s2480_s18 = sphi %s2606_s18, %s3064_s18  }
   0xf   : > { %3028 = sst [smem:[#allocation7_spill]] %s2484_s19  ;;  %s2074_s27 = sadd.s32 4294967294, %s2508_s25  }
  0x10   : > { %3029 = sst [smem:[#allocation8_spill]] %s2488_s20  ;;  %s37_s28 = sadd.s32 1, %s2500_s23 }
  0x11   : > { %3030 = sst [smem:[#allocation9_spill]] %s2492_s21  ;;  %p38_p0 = scmp.ge.s32.totalorder %s37_s28, 2 }
  0x12   : > { %3031 = sst [smem:[#allocation10_spill]] %s2496_s22  ;;  %s40_s29 = sadd.s32 1, %s2504_s24 }
  0x13   : > { %3032 = sst [smem:[#allocation11_spill]] %s2500_s23  ;;  %p437_p1 = scmp.ne.s32.totalorder %s2488_s20, %s2484_s19 }
  0x14   : > { %3033 = sst [smem:[#allocation12_spill]] %s2504_s24  ;;  %p438_p2 = scmp.eq.s32.totalorder %s2073_s26, 3 }
  0x15   : > { %3034 = sst [smem:[#allocation13_spill]] %s2508_s25  ;;  %s3072_s28 = smov (%p38_p0, %s37_s28), 0 }
  0x16   : > { %3035 = sst [smem:[#allocation14_spill]] %s3072_s28  ;;  %s3074_s29 = smov (!%p38_p0, %s40_s29), %s2504_s24 }
  0x17   : > { %p2655_p3 = por %p438_p2, %p437_p1  ;;  %p443_p4 = scmp.ne.s32.totalorder %s2484_s19, %s2480_s18 }
  0x18   : > { %p42_p5 = scmp.ge.s32.totalorder %s3074_s29, 2  ;;  %p444_p6 = scmp.eq.s32.totalorder %s2074_s27, 3 }
  0x19   : > { %s3036_s30 = scalar_select %p2655_p3, 1, 0 }
  0x1a   : > { %p2077_p7 = scmp.ge.s32.totalorder %s2508_s25, 1  ;;  %p555_p8 = scmp.lt.s32.totalorder %s2508_s25, 5 }
  0x1b   : > { %3037 = sst [smem:[#allocation15_spill]] %s3036_s30  ;;  %s3076_s29 = smov (%p42_p5, %s3074_s29), 0 }
  0x1c   : > { %3038 = sst [smem:[#allocation16_spill]] %s3076_s29  ;;  %p2665_p9 = por %p444_p6, %p443_p4 }
  0x1d   : > { %p556_p10 = pnand %p2077_p7, %p555_p8  ;;  %s424_s17 = ssub.s32 %s2504_s24, %s3076_s29 }
  0x1e   : > { %s3039_s16 = scalar_select %p2665_p9, 1, 0 }
  0x1f   : > { %s427_s26 = sadd.s32 1, %s2488_s20  ;;  %p425_p11 = scmp.eq.s32.totalorder %s424_s17, 0 }
  0x20   : > { %3040 = sst [smem:[#allocation17_spill]] %s3039_s16  ;;  %559 = sbr.rel (%p556_p10) target bundleno = 4677 (0x1245), region = 80 }
  0x21   : > { %s2673_s28 = scalar_select %p425_p11, %s2488_s20, %s427_s26  }
  0x22   : > { %s3007_s27 = sand.u32 (!%p556_p10), 1, %s2484_s19   ;;  %p646_p12 = scmp.lt.s32.totalorder (!%p556_p10), %s2496_s22, 1 }
  0x23   : > { %3041 = sst [smem:[#allocation18_spill]] %s2673_s28  ;;  %s2679_s23 = sshll.u32 (!%p556_p10), %s3007_s27, 3 }
  0x24   : > { %p650_p13 = scmp.lt.s32.totalorder (!%p556_p10), %s2492_s21, 1  ;;  %s3042_s0 = sld [smem:[#allocation19_spill]] (!%p556_p10) }
  0x25   : > { %s3043_s1 = sld [smem:[#allocation20_spill]] (!%p556_p10)  ;;  %s3044_s3 = sld [smem:[#allocation21_spill]] (!%p556_p10) }
  0x26   : > { %s3045_s7 = sld [smem:[#allocation22_spill]] (!%p556_p10)  ;;  %s3046_s28 = sld [smem:[#allocation23_spill]] (!%p556_p10) }
  0x27   : > { %s647_s16 = scalar_select %p646_p12, %s2496_s22, 1 }
  0x28   : > { %s2684_s18 = scalar_select %p650_p13, %s2492_s21, 1 }
  0x29   : > { %s2079_s17 = sshll.u32 %s647_s16, 3  ;;  %s645_s14 = scalar_lea.vmem [#allocation3], %s2679_s23 }
  0x2a   : > { %s649_s27 = scalar_lea.vmem %s3042_s0, %s2079_s17  ;;  %s2132_s24 = sshll.u32 %s2684_s18, 4 }
  0x2b   : > { %s654_s25 = scalar_lea.vmem %s3043_s1, %s2132_s24  ;;  %s2700_s13 = scalar_lea.vmem %s3044_s3, %s2132_s24 }
  0x2c   : > { %s2717_s30 = scalar_lea.vmem %s3045_s7, %s2132_s24  ;;  %s679_s19 = scalar_lea.vmem %s2995_s8, %s2684_s18 }
  0x2d   : > { %s2135_s3 = sshll.u32 %s2684_s18, 6  ;;  %s687_s29 = scalar_lea.vmem %s2997_s10, %s2684_s18 }
  0x2e   : > { %s2731_s0 = scalar_lea.vmem %s2996_s9, %s2135_s3  ;;  %s690_s1 = scalar_lea.vmem %s2998_s11, %s2684_s18 }
  0x2f   : > { %s693_s7 = scalar_lea.vmem %s3046_s28, %s2684_s18  ;;  %s3047_s22 = sld [smem:[#allocation9_spill]] }
  0x35   : > { %p2088_p0 = scmp.ne.s32.totalorder %s3047_s22, 0 }
  0x36   : > { %v699_v0 = vld [vmem:[%s649_s27] sm:$0xff] (!%p2088_p0)  ;;  %vm700_vm0 = vcmask (!%p2088_p0), 261120  }
  0x37   : > { %698 = sbr.rel (%p2088_p0) target bundleno = 62 (0x3e), region = 84  ;;  %701 = vst.msk [vmem:[#allocation2] sm:$0xff] (!%p2088_p0), %vm700_vm0, %v699_v0 }
  0x3e PF: > { %v2380_v1 = vld [vmem:[%s654_s25] sm:$0xff]   ;;  %v2510_v2 = vmov 0.0   ;;  %v2381_v3 = vld [vmem:[%s654_s25 + $0x8] sm:$0xff]   ;;  %vm2511_vm1 = vmmov 0   ;;  %vm727_vm2 = vcmask 261120   ;;  %s3048_s27 = scalar_lea.vmem %s2989_s2, %s2684_s18  ;;  %s2512_s28 = smov 96  }
  0x3f   : > { %2178 = vmatprep.subr.bf16.mxu0 %v2510_v2  ;;  %2204 = vmatprep.subr.bf16.mxu1 %v2510_v2  ;;  %v2747_v4 = vld [vmem:[#allocation2] sm:$0xff]  ;;  %s2513_s21 = smov 64   ;;  %vm818_vm3 = vcmask 1043456   ;;  %vm814_vm4 = vcmask 64512   ;;  %s2514_s16 = smov 88  }
  0x40   : > { %2179 = vmatpush3.bf16.msra.mxu0 %v2380_v1  ;;  %2182 = vmatprep.mubr.msk.bf16.mxu0 %vm2511_vm1, %v2510_v2  ;;  %v707_v5 = vpack.c.bf16 %v2747_v4, %v2747_v4  ;;  %v2089_v6 = vld [vmem:[%s3048_s27] ss:$0 sm:$0xff]  ;;  %s2515_s26 = smov 120   ;;  %s2516_s17 = smov 80   ;;  %v772_v0 = vld [vmem:[%s2700_s13 + $0x4] sm:$0xf] }
  0x41   : > { %2180 = vmatprep.subr.bf16.mxu0 %v2510_v2  ;;  %2206 = vmatprep.mubr.msk.bf16.mxu1 %vm2511_vm1, %v2510_v2  ;;  %s2517_s12 = smov 56   ;;  %s2518_s20 = smov 112   ;;  %v771_v59 = vld [vmem:[%s2700_s13] sm:$0xf]  ;;  %v1075_v1 = vsel %vm818_vm3, %v772_v0, 0 }
  0x42   : > { %s2519_s24 = smov 72   ;;  %v1121_v62 = vsel %vm818_vm3, %v771_v59, 0  ;;  %s2520_s15 = smov 48  }
  0x43   : > { %s2521_s22 = smov 104   ;;  %s2522_s3 = smov 40  }
  0x44   : > { %2181 = vmatpush3.bf16.msra.mxu0 %v2381_v3  ;;  %s3053_s25 = sld [smem:[#allocation9_spill]] }
  0x45   : > { %2186 = vmatprep.subr.bf16.mxu0 %v2510_v2 }
  0x47   : > { %2183 = vmatmul.mubr.msk.bf16.vlgmr.msra.gmra.mrb[0].mxu0 %vm727_vm2, %v707_v5 }
  0x48   : > { %2188 = vmatprep.mubr.msk.bf16.mxu0 %vm2511_vm1, %v2510_v2 }
  0x4a   : > { %p2123_p1 = scmp.ne.s32.totalorder %s3053_s25, 1 }
  0x4b   : > { %vm2524_vm5 = vmmov (!%p2123_p1), 0  }
 0x11a   : > { %v765_v7 = vpop.f32.mrb[0].mxu0 }
 0x11b   : > { %v2763_v8 = vadd.f32 %v2089_v6, %v765_v7  ;;  %v2184_v9 = vpop.f32.mrb[1].mxu0 }
 0x11c   : > { %v768_v10 = vpop.f32.mrb[2].mxu0 }
 0x11d   : > { %777 = vrot.lane.b32.xlu0 %v2763_v8, %s2512_s28  ;;  %v2185_v11 = vpop.f32.mrb[3].mxu0  ;;  %v2768_v13 = vpack.c.bf16 %v2763_v8, %v2763_v8  ;;  %v775_v16 = vmul.f32 0.35355338, %v2763_v8 }
 0x11f   : > { %v2773_v18 = vpack.c.bf16 %v775_v16, %v775_v16 }
 0x18f   : > { %v778_v12 = vpop.permute.xlu0 %777 }
 0x190   : > { %780 = vxpose.xlu0.b32.start.end [1/1] (short) (narrow) %v778_v12, 8 }
 0x1b9   : > { %876 = vrot.lane.b32.xlu0 %v2768_v13, %s2513_s21  ;;  %s3050_s21 = scalar_lea.vmem %s2992_s5, %s2684_s18 }
 0x210   : > { %v796_v14 = vpop.trf.xlu0 }
 0x211   : > { %v813_v15 = vpack.c.bf16 %v796_v14, %v796_v14 }
 0x213   : > { %v820_v17 = vsel %vm818_vm3, %v813_v15, 0 }
 0x214   : > { %2187 = vmatpush3.bf16.msra.mxu0 %v820_v17 }
 0x215   : > { %2192 = vmatprep.subr.bf16.mxu0 %v2510_v2 }
 0x217   : > { %2189 = vmatmul.mubr.msk.bf16.vlgmr.msra.gmra.mrb[4].mxu0 %vm814_vm4, %v2773_v18 }
 0x218   : > { %2194 = vmatprep.mubr.msk.bf16.mxu0 %vm2511_vm1, %v2510_v2 }
 0x22b   : > { %v877_v19 = vpop.permute.xlu0 %876 }
 0x22c   : > { %v882_v20 = vsel %vm818_vm3, %v877_v19, 0 }
 0x22d   : > { %2193 = vmatpush3.bf16.msra.mxu0 %v882_v20 }
 0x22e   : > { %2198 = vmatprep.subr.bf16.mxu0 %v2510_v2 }
 0x2ea   : > { %v856_v21 = vpop.f32.mrb[4].mxu0 }
 0x2eb   : > { %v2190_v22 = vpop.f32.mrb[5].mxu0  ;;  %v862_v23 = vsel %vm814_vm4, %v856_v21, -inf }
 0x2ec   : > { %863 = vmax.xlane.f32.xlu1 %v862_v23  ;;  %v859_v24 = vpop.f32.mrb[6].mxu0 }
 0x2ed   : > { %v2191_v25 = vpop.f32.mrb[7].mxu0 }
 0x2fd   : > { %925 = vrot.lane.b32.xlu1 %v2763_v8, %s2514_s16 }
 0x379   : > { %v864_v26 = vpop.xlane.xlu1 %863 }
 0x37a   : > { %v865_v27 = vsub.f32 %v856_v21, %v864_v26 }
 0x37c   : > { %v866_v28 = vmul.f32 1.442695, %v865_v27 }
 0x37d   : > { %v926_v31 = vpop.permute.xlu1 %925 }
 0x37e   : > { %2392 = vpow2.f32 %v866_v28 }
 0x388   : > { %v2393_v29 = vpop.eup %2392 }
 0x389   : > { %v868_v30 = vsel %vm814_vm4, %v2393_v29, 0.0 }
 0x38a   : > { %869 = vadd.xlane.f32.xlu1 %v868_v30 }
 0x39b   : > { %962 = vrot.lane.b32.xlu1 %v2773_v18, %s2515_s26 }
 0x3c4   : > { %928 = vxpose.xlu1.b32.start.end [1/1] (short) (narrow) %v926_v31, 8 }
 0x3e2   : > { %1163 = vrot.lane.b32.xlu1 %v2763_v8, %s2516_s17  ;;  %s3051_s17 = scalar_lea.vmem %s2993_s6, %s2684_s18 }
 0x417   : > { %v870_v32 = vpop.xlane.xlu1 %869 }
 0x418   : > { %2394 = vrcp.f32 %v870_v32 }
 0x41b   : > { %v963_v36 = vpop.permute.xlu1 %962 }
 0x422   : > { %v2395_v33 = vpop.eup %2394 }
 0x423   : > { %v872_v34 = vmul.f32 %v2395_v33, %v2393_v29 }
 0x425   : > { %v873_v35 = vpack.c.bf16 %v872_v34, %v872_v34 }
 0x427   : > { %2195 = vmatmul.mubr.msk.bf16.vlgmr.msra.gmra.mrb[8].mxu0 %vm814_vm4, %v873_v35 }
 0x428   : > { %2200 = vmatprep.mubr.msk.bf16.mxu0 %vm2511_vm1, %v2510_v2 }
 0x444   : > { %v944_v37 = vpop.trf.xlu1 }
 0x445   : > { %v960_v38 = vpack.c.bf16 %v944_v37, %v944_v37 }
 0x447   : > { %v968_v39 = vsel %vm818_vm3, %v960_v38, 0 }
 0x448   : > { %2199 = vmatpush3.bf16.msra.mxu0 %v968_v39 }
 0x449   : > { %2210 = vmatprep.subr.bf16.mxu0 %v2510_v2 }
 0x44b   : > { %2201 = vmatmul.mubr.msk.bf16.vlgmr.msra.gmra.mrb[12].mxu0 %vm814_vm4, %v963_v36 }
 0x44c   : > { %2212 = vmatprep.mubr.msk.bf16.mxu0 %vm2511_vm1, %v2510_v2  ;;  %2211 = vmatpush3.bf16.msra.mxu0 %v1075_v1 }
 0x44d   : > { %2222 = vmatprep.subr.bf16.mxu0 %v2510_v2 }
 0x454   : > { %v1164_v54 = vpop.permute.xlu1 %1163 }
 0x4fa   : > { %v918_v40 = vpop.f32.mrb[8].mxu0 }
 0x4fb   : > { %v2196_v41 = vpop.f32.mrb[9].mxu0  ;;  %v924_v63 = vpack.c.bf16 %v918_v40, %v918_v40 }
 0x4fc   : > { %v921_v42 = vpop.f32.mrb[10].mxu0 }
 0x4fd   : > { %v2197_v43 = vpop.f32.mrb[11].mxu0 }
 0x51e   : > { %v1004_v44 = vpop.f32.mrb[12].mxu0 }
 0x51f   : > { %v2202_v45 = vpop.f32.mrb[13].mxu0  ;;  %v1010_v46 = vsel %vm814_vm4, %v1004_v44, -inf }
 0x520   : > { %1011 = vmax.xlane.f32.xlu0 %v1010_v46  ;;  %v1007_v47 = vpop.f32.mrb[14].mxu0 }
 0x521   : > { %v2203_v48 = vpop.f32.mrb[15].mxu0 }
 0x5ad   : > { %v1012_v49 = vpop.xlane.xlu0 %1011 }
 0x5ae   : > { %v1013_v50 = vsub.f32 %v1004_v44, %v1012_v49 }
 0x5b0   : > { %v1014_v51 = vmul.f32 1.442695, %v1013_v50 }
 0x5b2   : > { %2396 = vpow2.f32 %v1014_v51 }
 0x5bc   : > { %v2397_v52 = vpop.eup %2396 }
 0x5bd   : > { %v1016_v53 = vsel %vm814_vm4, %v2397_v52, 0.0 }
 0x5be   : > { %1017 = vadd.xlane.f32.xlu0 %v1016_v53 }
 0x5d4   : > { %1022 = vrot.lane.b32.xlu0 %v2768_v13, %s2517_s12 }
 0x5d8   : > { %1199 = vrot.lane.b32.xlu0 %v2773_v18, %s2518_s20 }
 0x5f6   : > { %1166 = vxpose.xlu0.b32.start.end [1/1] (short) (narrow) %v1164_v54, 8 }
 0x61f   : > { %1355 = vrot.lane.b32.xlu0 %v2763_v8, %s2519_s24 }
 0x64b   : > { %v1018_v55 = vpop.xlane.xlu0 %1017 }
 0x64c   : > { %2398 = vrcp.f32 %v1018_v55 }
 0x64f   : > { %v1023_v56 = vpop.permute.xlu0 %1022 }
 0x650   : > { %v1028_v57 = vsel %vm818_vm3, %v1023_v56, 0 }
 0x651   : > { %2205 = vmatpush3.bf16.msra.mxu1 %v1028_v57 }
 0x652   : > { %2216 = vmatprep.subr.bf16.mxu1 %v2510_v2 }
 0x653   : > { %v1200_v3 = vpop.permute.xlu0 %1199 }
 0x656   : > { %v2399_v58 = vpop.eup %2398 }
 0x657   : > { %v1020_v60 = vmul.f32 %v2399_v58, %v2397_v52 }
 0x659   : > { %v1021_v61 = vpack.c.bf16 %v1020_v60, %v1020_v60 }
 0x65b   : > { %2207 = vmatmul.mubr.msk.bf16.vlgmr.msra.gmra.mrb[0].mxu1 %vm814_vm4, %v1021_v61 }
 0x65c   : > { %2217 = vmatpush3.bf16.msra.mxu1 %v1121_v62  ;;  %2218 = vmatprep.mubr.msk.bf16.mxu1 %vm2511_vm1, %v2510_v2 }
 0x65d   : > { %2228 = vmatprep.subr.bf16.mxu1 %v2510_v2 }
 0x663   : > { %2219 = vmatmul.mubr.msk.bf16.vlgmr.msra.gmra.mrb[4].mxu1 %vm814_vm4, %v924_v63 }
 0x664   : > { %2230 = vmatprep.mubr.msk.bf16.mxu1 %vm2511_vm1, %v2510_v2 }
 0x676   : > { %v1182_v5 = vpop.trf.xlu0 }
 0x677   : > { %v1198_v6 = vpack.c.bf16 %v1182_v5, %v1182_v5 }
 0x679   : > { %v1205_v8 = vsel %vm818_vm3, %v1198_v6, 0 }
 0x691   : > { %v1356_v36 = vpop.permute.xlu0 %1355 }
 0x72e   : > { %v1064_v7 = vpop.f32.mrb[0].mxu1 }
 0x72f   : > { %v1070_v9 = vpack.c.bf16 %v1064_v7, %v1064_v7  ;;  %v2208_v10 = vpop.f32.mrb[1].mxu1 }
 0x730   : > { %v1067_v11 = vpop.f32.mrb[2].mxu1  ;;  %v774_v10 = vld [vmem:[%s2700_s13 + $0xc] sm:$0xf] }
 0x731   : > { %v2209_v12 = vpop.f32.mrb[3].mxu1  ;;  %2213 = vmatmul.mubr.msk.bf16.vlgmr.msra.gmra.mrb[16].mxu0 %vm814_vm4, %v1070_v9 }
 0x732   : > { %2223 = vmatpush3.bf16.msra.mxu0 %v1205_v8  ;;  %2224 = vmatprep.mubr.msk.bf16.mxu0 %vm2511_vm1, %v2510_v2 }
 0x733   : > { %2234 = vmatprep.subr.bf16.mxu0 %v2510_v2 }
 0x736   : > { %v1157_v14 = vpop.f32.mrb[4].mxu1 }
 0x737   : > { %v2220_v15 = vpop.f32.mrb[5].mxu1 }
 0x738   : > { %v1160_v16 = vpop.f32.mrb[6].mxu1 }
 0x739   : > { %v2221_v17 = vpop.f32.mrb[7].mxu1  ;;  %2225 = vmatmul.mubr.msk.bf16.vlgmr.msra.gmra.mrb[20].mxu0 %vm814_vm4, %v1200_v3 }
 0x73a   : > { %2236 = vmatprep.mubr.msk.bf16.mxu0 %vm2511_vm1, %v2510_v2 }
 0x804   : > { %v1111_v19 = vpop.f32.mrb[16].mxu0 }
 0x805   : > { %v2822_v20 = vadd.f32 %v1157_v14, %v1111_v19  ;;  %v2214_v21 = vpop.f32.mrb[17].mxu0 }
 0x806   : > { %v1114_v22 = vpop.f32.mrb[18].mxu0 }
 0x807   : > { %v2215_v23 = vpop.f32.mrb[19].mxu0 }
 0x80c   : > { %v1241_v24 = vpop.f32.mrb[20].mxu0 }
 0x80d   : > { %v2226_v25 = vpop.f32.mrb[21].mxu0  ;;  %v1247_v26 = vsel %vm814_vm4, %v1241_v24, -inf }
 0x80e   : > { %1248 = vmax.xlane.f32.xlu1 %v1247_v26  ;;  %v1244_v27 = vpop.f32.mrb[22].mxu0 }
 0x80f   : > { %v2227_v28 = vpop.f32.mrb[23].mxu0 }
 0x81f   : > { %1259 = vrot.lane.b32.xlu1 %v2768_v13, %s2520_s15 }
 0x89b   : > { %v1249_v29 = vpop.xlane.xlu1 %1248 }
 0x89c   : > { %v1250_v30 = vsub.f32 %v1241_v24, %v1249_v29 }
 0x89e   : > { %v1251_v31 = vmul.f32 1.442695, %v1250_v30 }
 0x89f   : > { %v1260_v32 = vpop.permute.xlu1 %1259 }
 0x8a0   : > { %2400 = vpow2.f32 %v1251_v31  ;;  %v1265_v33 = vsel %vm818_vm3, %v1260_v32, 0  ;;  %v2382_v32 = vld [vmem:[%s2717_s30] sm:$0xff]  }
 0x8a1   : > { %2229 = vmatpush3.bf16.msra.mxu1 %v1265_v33  ;;  %v2383_v33 = vld [vmem:[%s2717_s30 + $0x8] sm:$0xff]   ;;  %s3054_s30 = sld [smem:[#allocation24_spill]] (!%p2123_p1) }
 0x8a2   : > { %2240 = vmatprep.subr.bf16.mxu1 %v2510_v2 }
 0x8aa   : > { %v2401_v34 = vpop.eup %2400 }
 0x8ab   : > { %v1253_v35 = vsel %vm814_vm4, %v2401_v34, 0.0 }
 0x8ac   : > { %1254 = vadd.xlane.f32.xlu1 %v1253_v35  ;;  %v2386_v35 = vld [vmem:[%s2731_s0 + $0x10] sm:$0xff]  }
 0x8bd   : > { %1391 = vrot.lane.b32.xlu1 %v2773_v18, %s2521_s22  ;;  %v773_v18 = vld [vmem:[%s2700_s13 + $0x8] sm:$0xf]  ;;  %s3049_s13 = scalar_lea.vmem %s2991_s4, %s2684_s18 }
 0x8be   : > { %v1312_v45 = vsel %vm818_vm3, %v773_v18, 0  ;;  %v2105_v19 = vld [vmem:[%s3049_s13] ss:$0 sm:$0xff] }
 0x8bf   : > { %2235 = vmatpush3.bf16.msra.mxu0 %v1312_v45  ;;  %v2107_v18 = vld [vmem:[%s3051_s17] ss:$0 sm:$0xff] }
 0x8c0   : > { %2246 = vmatprep.subr.bf16.mxu0 %v2510_v2 }
 0x8e6   : > { %1358 = vxpose.xlu1.b32.start.end [1/1] (short) (narrow) %v1356_v36, 8  ;;  %v2387_v36 = vld [vmem:[%s2731_s0 + $0x18] sm:$0xff]  }
 0x939   : > { %v1255_v37 = vpop.xlane.xlu1 %1254 }
 0x93a   : > { %2402 = vrcp.f32 %v1255_v37  ;;  %v2388_v37 = vld [vmem:[%s2731_s0 + $0x20] sm:$0xff]  }
 0x93d   : > { %v1392_v41 = vpop.permute.xlu1 %1391 }
 0x944   : > { %v2403_v38 = vpop.eup %2402 }
 0x945   : > { %v1257_v39 = vmul.f32 %v2403_v38, %v2401_v34  ;;  %v2385_v34 = vld [vmem:[%s2731_s0 + $0x8] sm:$0xff]  }
 0x946   : > { %v2389_v38 = vld [vmem:[%s2731_s0 + $0x28] sm:$0xff]  }
 0x947   : > { %v1258_v40 = vpack.c.bf16 %v1257_v39, %v1257_v39 }
 0x949   : > { %2231 = vmatmul.mubr.msk.bf16.vlgmr.msra.gmra.mrb[8].mxu1 %vm814_vm4, %v1258_v40 }
 0x94a   : > { %2242 = vmatprep.mubr.msk.bf16.mxu1 %vm2511_vm1, %v2510_v2 }
 0x966   : > { %v1374_v42 = vpop.trf.xlu1 }
 0x967   : > { %v1390_v43 = vpack.c.bf16 %v1374_v42, %v1374_v42 }
 0x969   : > { %v1397_v44 = vsel %vm818_vm3, %v1390_v43, 0  ;;  %v2106_v43 = vld [vmem:[%s3050_s21] ss:$0 sm:$0xff]  ;;  %s3055_s21 = sld [smem:[#allocation25_spill]] (!%p2123_p1) }
 0x96a   : > { %2241 = vmatpush3.bf16.msra.mxu1 %v1397_v44 }
 0x96b   : > { %2252 = vmatprep.subr.bf16.mxu1 %v2510_v2 }
 0x96d   : > { %2243 = vmatmul.mubr.msk.bf16.vlgmr.msra.gmra.mrb[12].mxu1 %vm814_vm4, %v1392_v41 }
 0x96e   : > { %2254 = vmatprep.mubr.msk.bf16.mxu1 %vm2511_vm1, %v2510_v2 }
 0xa1c   : > { %v1301_v46 = vpop.f32.mrb[8].mxu1 }
 0xa1d   : > { %v1307_v47 = vpack.c.bf16 %v1301_v46, %v1301_v46  ;;  %v2232_v48 = vpop.f32.mrb[9].mxu1 }
 0xa1e   : > { %v1304_v49 = vpop.f32.mrb[10].mxu1  ;;  %v2390_v48 = vld [vmem:[%s2731_s0 + $0x30] sm:$0xff]  }
 0xa1f   : > { %v2233_v50 = vpop.f32.mrb[11].mxu1  ;;  %2237 = vmatmul.mubr.msk.bf16.vlgmr.msra.gmra.mrb[24].mxu0 %vm814_vm4, %v1307_v47  ;;  %v2391_v49 = vld [vmem:[%s2731_s0 + $0x38] sm:$0xff]  }
 0xa20   : > { %2248 = vmatprep.mubr.msk.bf16.mxu0 %vm2511_vm1, %v2510_v2  ;;  %v2108_v50 = vld [vmem:[%s679_s19] ss:$0 sm:$0xff] }
 0xa40   : > { %v1433_v51 = vpop.f32.mrb[12].mxu1 }
 0xa41   : > { %v2244_v52 = vpop.f32.mrb[13].mxu1  ;;  %v1439_v53 = vsel %vm814_vm4, %v1433_v51, -inf }
 0xa42   : > { %1440 = vmax.xlane.f32.xlu0 %v1439_v53  ;;  %v1436_v54 = vpop.f32.mrb[14].mxu1 }
 0xa43   : > { %v2245_v55 = vpop.f32.mrb[15].mxu1 }
 0xacf   : > { %v1441_v56 = vpop.xlane.xlu0 %1440 }
 0xad0   : > { %v1442_v57 = vsub.f32 %v1433_v51, %v1441_v56 }
 0xad2   : > { %v1443_v58 = vmul.f32 1.442695, %v1442_v57 }
 0xad4   : > { %2404 = vpow2.f32 %v1443_v58 }
 0xade   : > { %v2405_v59 = vpop.eup %2404 }
 0xadf   : > { %v1445_v60 = vsel %vm814_vm4, %v2405_v59, 0.0 }
 0xae0   : > { %1446 = vadd.xlane.f32.xlu0 %v1445_v60 }
 0xaf2   : > { %v1348_v61 = vpop.f32.mrb[24].mxu0 }
 0xaf3   : > { %v1354_v62 = vadd.f32 %v1348_v61, %v2822_v20  ;;  %v2238_v63 = vpop.f32.mrb[25].mxu0 }
 0xaf4   : > { %v1351_v0 = vpop.f32.mrb[26].mxu0 }
 0xaf5   : > { %v2239_v1 = vpop.f32.mrb[27].mxu0 }
 0xaf6   : > { %1451 = vrot.lane.b32.xlu0 %v2768_v13, %s2522_s3  ;;  %v1504_v13 = vsel %vm818_vm3, %v774_v10, 0 }
 0xaf7   : > { %2253 = vmatpush3.bf16.msra.mxu1 %v1504_v13 }
 0xaf8   : > { %2266 = vmatprep.subr.bf16.mxu1 %v2510_v2 }
 0xb6d   : > { %v1447_v3 = vpop.xlane.xlu0 %1446 }
 0xb6e   : > { %2406 = vrcp.f32 %v1447_v3 }
 0xb71   : > { %v1452_v5 = vpop.permute.xlu0 %1451 }
 0xb72   : > { %v1457_v6 = vsel %vm818_vm3, %v1452_v5, 0 }
 0xb73   : > { %2247 = vmatpush3.bf16.msra.mxu0 %v1457_v6 }
 0xb74   : > { %2258 = vmatprep.subr.bf16.mxu0 %v2510_v2 }
 0xb78   : > { %v2407_v7 = vpop.eup %2406 }
 0xb79   : > { %v1449_v8 = vmul.f32 %v2407_v7, %v2405_v59 }
 0xb7b   : > { %v1450_v9 = vpack.c.bf16 %v1449_v8, %v1449_v8 }
 0xb7d   : > { %2249 = vmatmul.mubr.msk.bf16.vlgmr.msra.gmra.mrb[28].mxu0 %vm814_vm4, %v1450_v9 }
 0xb7e   : > { %2262 = vmatprep.mubr.msk.bf16.mxu0 %vm2511_vm1, %v2510_v2  ;;  %2259 = vmatpush3.bf16.msra.mxu0 %v2382_v32 }
 0xb7f   : > { %2260 = vmatprep.subr.bf16.mxu0 %v2510_v2 }
 0xb82   : > { %2261 = vmatpush3.bf16.msra.mxu0 %v2383_v33 }
 0xc50   : > { %v1493_v11 = vpop.f32.mrb[28].mxu0 }
 0xc51   : > { %v1499_v12 = vpack.c.bf16 %v1493_v11, %v1493_v11  ;;  %v2250_v14 = vpop.f32.mrb[29].mxu0  ;;  %v2121_v11 = vld [vmem:[%s690_s1] ss:$0 sm:$0xff] }
 0xc52   : > { %v1496_v15 = vpop.f32.mrb[30].mxu0  ;;  %v2122_v14 = vld [vmem:[%s693_s7] ss:$0 sm:$0xff] }
 0xc53   : > { %v2251_v16 = vpop.f32.mrb[31].mxu0  ;;  %2255 = vmatmul.mubr.msk.bf16.vlgmr.msra.gmra.mrb[16].mxu1 %vm814_vm4, %v1499_v12 }
 0xc54   : > { %2282 = vmatprep.mubr.msk.bf16.mxu1 %vm2511_vm1, %v2510_v2 }
 0xd26   : > { %v1540_v17 = vpop.f32.mrb[16].mxu1 }
 0xd27   : > { %v1546_v20 = vadd.f32 %v1540_v17, %v1354_v62  ;;  %v2256_v21 = vpop.f32.mrb[17].mxu1  ;;  %v2412_v17 = vld [vmem:[%s3054_s30] sm:$0xff] (!%p2123_p1)  }
 0xd28   : > { %v1543_v22 = vpop.f32.mrb[18].mxu1 }
 0xd29   : > { %v1554_v23 = vadd.f32 %v2105_v19, %v1546_v20  ;;  %v2257_v24 = vpop.f32.mrb[19].mxu1  ;;  %v2523_v19 = vmov (!%p2123_p1), 0.0   ;;  %v2413_v20 = vld [vmem:[%s3054_s30 + $0x8] sm:$0xff] (!%p2123_p1)   ;;  %v2124_v22 = vld [vmem:[%s3055_s21] ss:$0 sm:$0xff] (!%p2123_p1) }
 0xd2a   : > { %2286 = vmatprep.subr.bf16.mxu0 (!%p2123_p1), %v2523_v19 }
 0xd2b   : > { %v1555_v25 = vadd.f32 %v1554_v23, %v2747_v4  ;;  %v2384_v4 = vld [vmem:[%s2731_s0] sm:$0xff]  }
 0xd2c   : > { %2267 = vmatpush3.bf16.msra.mxu1 %v2384_v4 }
 0xd2d   : > { %v1558_v26 = vsel %vm727_vm2, %v1555_v25, 0.0  ;;  %2268 = vmatprep.subr.bf16.mxu1 %v2510_v2 }
 0xd2e   : > { %1559 = vadd.xlane.f32.xlu1 %v1558_v26 }
 0xd30   : > { %2269 = vmatpush3.bf16.msra.mxu1 %v2385_v34 }
 0xd31   : > { %2270 = vmatprep.subr.bf16.mxu1 %v2510_v2 }
 0xd34   : > { %2271 = vmatpush3.bf16.msra.mxu1 %v2386_v35 }
 0xd35   : > { %2272 = vmatprep.subr.bf16.mxu1 %v2510_v2 }
 0xd38   : > { %2273 = vmatpush3.bf16.msra.mxu1 %v2387_v36 }
 0xd39   : > { %2274 = vmatprep.subr.bf16.mxu1 %v2510_v2 }
 0xd3c   : > { %2275 = vmatpush3.bf16.msra.mxu1 %v2388_v37 }
 0xd3d   : > { %2276 = vmatprep.subr.bf16.mxu1 %v2510_v2 }
 0xd40   : > { %2277 = vmatpush3.bf16.msra.mxu1 %v2389_v38 }
 0xd41   : > { %2278 = vmatprep.subr.bf16.mxu1 %v2510_v2 }
 0xd44   : > { %2279 = vmatpush3.bf16.msra.mxu1 %v2390_v48 }
 0xd45   : > { %2280 = vmatprep.subr.bf16.mxu1 %v2510_v2  ;;  %v2112_v2 = vld [vmem:[%s687_s29] ss:$0 sm:$0xff] }
 0xd48   : > { %2281 = vmatpush3.bf16.msra.mxu1 %v2391_v49 }
 0xdbb   : > { %v1560_v27 = vpop.xlane.xlu1 %1559 }
 0xdbc   : > { %v1562_v28 = vmul.f32 0.03125, %v1560_v27 }
 0xdbe   : > { %v1563_v29 = vsub.f32 %v1555_v25, %v1562_v28 }
 0xdc0   : > { %v1564_v30 = vmul.f32 %v1563_v29, %v1563_v29 }
 0xdc2   : > { %v1565_v31 = vsel %vm727_vm2, %v1564_v30, 0.0 }
 0xdc3   : > { %1566 = vadd.xlane.f32.xlu0 %v1565_v31 }
 0xe50   : > { %v1567_v39 = vpop.xlane.xlu0 %1566 }
 0xe51   : > { %v1568_v40 = vmul.f32 0.03125, %v1567_v39 }
 0xe53   : > { %v1569_v41 = vadd.f32 1e-05, %v1568_v40 }
 0xe55   : > { %2408 = vrsqrt.f32 %v1569_v41 }
 0xe5f   : > { %v2409_v42 = vpop.eup %2408 }
 0xe60   : > { %v1571_v44 = vmul.f32 %v2409_v42, %v1563_v29 }
 0xe62   : > { %v1578_v45 = vmul.f32 %v2106_v43, %v1571_v44 }
 0xe64   : > { %v1585_v46 = vadd.f32 %v2107_v18, %v1578_v45 }
 0xe66   : > { %v1590_v47 = vpack.c.bf16 %v1585_v46, %v1585_v46 }
 0xe68   : > { %2263 = vmatmul.mubr.msk.bf16.vlgmr.msra.gmra.mrb[32].mxu0 %vm727_vm2, %v1590_v47 }
 0xe69   : > { %2287 = vmatpush3.bf16.msra.mxu0 (!%p2123_p1), %v2412_v17  ;;  %2290 = vmatprep.mubr.msk.bf16.mxu0 (!%p2123_p1), %vm2524_vm5, %v2523_v19 }
 0xe6a   : > { %2288 = vmatprep.subr.bf16.mxu0 (!%p2123_p1), %v2523_v19 }
 0xe6d   : > { %2289 = vmatpush3.bf16.msra.mxu0 (!%p2123_p1), %v2413_v20 }
 0xf3b   : > { %v1647_v51 = vpop.f32.mrb[32].mxu0 }
 0xf3c   : > { %v1648_v52 = vadd.f32 %v2108_v50, %v1647_v51  ;;  %v2264_v53 = vpop.f32.mrb[33].mxu0 }
 0xf3d   : > { %v1650_v54 = vpop.f32.mrb[34].mxu0 }
 0xf3e   : > { %v1653_v55 = vmax.f32 %v1648_v52, 0.0  ;;  %v2265_v56 = vpop.f32.mrb[35].mxu0 }
 0xf40   : > { %v1670_v57 = vpack.c.bf16 %v1653_v55, %v1653_v55 }
 0xf42   : > { %2283 = vmatmul.mubr.bf16.vlgmr.msra.gmra.mrb[20].mxu1 %v1670_v57 }
0x1015   : > { %v1760_v58 = vpop.f32.mrb[20].mxu1 }
0x1016   : > { %v1761_v59 = vadd.f32 %v2112_v2, %v1760_v58  ;;  %v2284_v60 = vpop.f32.mrb[21].mxu1 }
0x1017   : > { %v1763_v61 = vpop.f32.mrb[22].mxu1 }
0x1018   : > { %v2285_v62 = vpop.f32.mrb[23].mxu1  ;;  %v1766_v63 = vadd.f32 %v1761_v59, %v1585_v46 }
0x101a   : > { %v1769_v0 = vsel %vm727_vm2, %v1766_v63, 0.0 }
0x101b   : > { %1770 = vadd.xlane.f32.xlu1 %v1769_v0 }
0x10a8   : > { %v1771_v1 = vpop.xlane.xlu1 %1770 }
0x10a9   : > { %v1772_v3 = vmul.f32 0.03125, %v1771_v1 }
0x10ab   : > { %v1773_v5 = vsub.f32 %v1766_v63, %v1772_v3 }
0x10ad   : > { %v1774_v6 = vmul.f32 %v1773_v5, %v1773_v5 }
0x10af   : > { %v1775_v7 = vsel %vm727_vm2, %v1774_v6, 0.0 }
0x10b0   : > { %1776 = vadd.xlane.f32.xlu1 %v1775_v7 }
0x113d   : > { %v1777_v8 = vpop.xlane.xlu1 %1776 }
0x113e   : > { %v1778_v9 = vmul.f32 0.03125, %v1777_v8 }
0x1140   : > { %v1779_v10 = vadd.f32 1e-05, %v1778_v9 }
0x1142   : > { %2410 = vrsqrt.f32 %v1779_v10 }
0x114c   : > { %v2411_v13 = vpop.eup %2410 }
0x114d   : > { %v1781_v12 = vmul.f32 %v2411_v13, %v1773_v5  ;;  %1800 = sbr.rel (%p2123_p1) target bundleno = 4652 (0x122c), region = 88 }
0x114f   : > { %v1788_v15 = vmul.f32 %v2121_v11, %v1781_v12 }
0x1151   : > { %v1795_v16 = vadd.f32 %v2122_v14, %v1788_v15 }
0x1153   : > { %1796 = vst.msk [vmem:[#allocation2] sm:$0xff] %vm727_vm2, %v1795_v16  ;;  %v1805_v21 = vpack.c.bf16 (!%p2123_p1), %v1795_v16, %v1795_v16 }
0x1155   : > { %2291 = vmatmul.mubr.msk.bf16.vlgmr.msra.gmra.mrb[0].mxu0 %vm727_vm2, %v1805_v21 }
0x1228   : > { %v1862_v23 = vpop.f32.mrb[0].mxu0 }
0x1229   : > { %v1863_v24 = vadd.f32 %v2124_v22, %v1862_v23  ;;  %v2292_v25 = vpop.f32.mrb[1].mxu0 }
0x122a   : > { %v1865_v26 = vpop.f32.mrb[2].mxu0 }
0x122b   : > { %1868 = vst [vmem:[%s645_s14] sm:$0xff] %v1863_v24  ;;  %v2293_v27 = vpop.f32.mrb[3].mxu0 }
0x122c PF: > { %s3056_s16 = sld [smem:[#allocation10_spill]]  ;;  %s3057_s26 = sld [smem:[#allocation7_spill]] }
0x122d   : > { %s3059_s15 = sld [smem:[#allocation26_spill]]  ;;  %s1883_s19 = sshll.u32 %s645_s14, 4  ;;  %s1884_s19 = int_to_ptr.vmem [resolvable:$true] %s1883_s19 }
0x122e   : > { %s2414_s3 = scalar_lea.vmem %s1884_s19, 128  ;;  %s2525_s25 = smov [#allocation3]  }
0x122f   : > { %p2415_p2 = scmp.ne.s32.totalorder %s1884_s19, %s2414_s3  ;;  %s2418_s27 = sshll.u32 %s2525_s25, 4  ;;  %s2419_s27 = int_to_ptr.vmem [resolvable:$false] %s2418_s27 }
0x1230   : > { %s2420_s13 = scalar_lea.vmem %s2419_s27, 256  ;;  %p2421_p6 = scmp.lt.s32.totalorder %s1884_s19, %s2419_s27 }
0x1231   : > { %p2416_p4 = pnand %p2415_p2, %p2655_p3  ;;  %p2422_p7 = scmp.lt.s32.totalorder %s2420_s13, %s2414_s3 }
0x1232   : > { %s2129_s12 = sshll.u32 %s3056_s16, 7  ;;  %s3060_s29 = sand.u32 1, %s3057_s26  }
0x1233   : > { %s2936_s0 = scalar_lea.hbm %s3059_s15, %s2129_s12  ;;  %s1870_s22 = scalar_lea.sflag [#allocation4], %s3060_s29 }
0x1234   : > { %p2417_p5 = pneg %p2416_p4  ;;  %p2423_p8 = por %p2422_p7, %p2421_p6 }
0x1236   : > { %p2424_p10 = pnand %p2423_p8, %p2417_p5 }
0x1238   : > { %2427 = shalt.err (!%p2424_p10)
}
0x1239   : > { %s2428_s23 = scalar_lea.hbm %s2936_s0, 128  ;;  %s2432_s28 = scalar_lea.hbm %s3059_s15, 256 }
0x123a   : > { %p2429_p11 = scmp.ne.s32.totalorder %s2936_s0, %s2428_s23  ;;  %p2433_p0 = scmp.lt.u32.totalorder %s2936_s0, %s3059_s15 }
0x123b   : > { %p2434_p1 = scmp.lt.u32.totalorder %s2432_s28, %s2428_s23  ;;  %p2436_p4 = scmp.lt.u32.totalorder %s2428_s23, %s2936_s0 }
0x123c   : > { %p2430_p12 = pnand %p2429_p11, %p2655_p3 }
0x123d   : > { %p2435_p2 = por %p2434_p1, %p2433_p0 }
0x123e   : > { %p2431_p13 = pneg %p2430_p12 }
0x123f   : > { %p2437_p5 = por %p2436_p4, %p2435_p2 }
0x1241   : > { %p2438_p6 = pnand %p2437_p5, %p2431_p13 }
0x1243   : > { %2441 = shalt.err (!%p2438_p6)
}
0x1244   : > { %2294 = dma.vmem_to_hbm [thread:$0]  (%p2655_p3), %s1884_s19, 128, %s2936_s0, %s1870_s22  }
0x1245 PF: > { %s3061_s21 = sld [smem:[#allocation13_spill]]  ;;  %s3062_s16 = sld [smem:[#allocation6_spill]] }
0x124b   : > { %p2300_p7 = scmp.ge.s32.totalorder %s3061_s21, 2  ;;  %s1895_s12 = sand.u32 1, %s3062_s16  }
0x124c   : > { %s1896_s20 = scalar_lea.sflag [#allocation4], %s1895_s12 }
0x124d   : > { %p2297_p8 = pnand %p2300_p7, %p2665_p9 }
0x124f   : > { %2475 = dma.done.wait (!%p2297_p8), %s1896_s20, 128  }
0x1250   : > { %2477 = vsyncadd (!%p2297_p8), %s1896_s20, 4294967168  ;;  %s28_s25 = sadd.s32 1, %s3061_s21   ;;  %s3064_s18 = sld [smem:[#allocation7_spill]] }
0x1251   : > { %p25_p10 = scmp.ge.s32.totalorder %s28_s25, 6   ;;  %s3065_s19 = sld [smem:[#allocation8_spill]] }
0x1252   : > { %s3066_s20 = sld [smem:[#allocation18_spill]]  ;;  %s3067_s21 = sld [smem:[#allocation11_spill]] }
0x1253   : > { %s3068_s22 = sld [smem:[#allocation12_spill]]  ;;  %s3069_s23 = sld [smem:[#allocation14_spill]] }
0x1254   : > { %s3070_s24 = sld [smem:[#allocation16_spill]]  ;;  %27 = sbr.rel (!%p25_p10) target bundleno = 14 (0xe), region = 159 }
0x125b   :  { %1901 = vsyncpa [#allocation4], 1 }
0x125c   :  { %1903 = vsyncpa [#allocation4 + $0x1], 1 }

</bundles_post_ra>
